<compile_context>
chip_gen: v7x
topology: tpu7x:2x2x1
jax: 0.10.0
libtpu: 0.0.40
codegen_flags: <defaults>
</compile_context>

<pallas_src>
import functools

import jax
import jax.numpy as jnp
import numpy as np
from jax import lax
from jax.experimental import pallas as pl
from jax.experimental.pallas import tpu as pltpu


def _shifted(a, d, axis):
    """out[..., i, ...] = a[..., i + d, ...], zero-filled at the boundary."""
    if d == 0:
        return a
    z_shape = list(a.shape)
    z_shape[axis] = abs(d)
    z = jnp.zeros(z_shape, a.dtype)
    idx = [slice(None)] * a.ndim
    if d > 0:
        idx[axis] = slice(d, None)
        return jnp.concatenate([a[tuple(idx)], z], axis=axis)
    idx[axis] = slice(None, d)
    return jnp.concatenate([z, a[tuple(idx)]], axis=axis)


def _cdn_kernel(x1col_ref, w1_ref, b1_ref, w2_ref, b2_ref, out_ref, *, H, W):
    """One grid step = one image.

    x1col_ref: (1, H*W, K1P)   bf16  conv1 im2col (K padded to 128 lanes)
    w1_ref   : (K1P, C1P)      bf16  conv1 weight (rows/cols zero-padded)
    b1_ref   : (1, C1P)        f32
    w2_ref   : (9, C1P, C2)    bf16  conv2 weight, one (C1P, C2) slab per tap
    b2_ref   : (1, C2)         f32
    out_ref  : (1, 1, C2)      f32   global-average-pooled features
    """
    HW = H * W
    C1P = w1_ref.shape[1]
    C2 = w2_ref.shape[2]

    # ---- conv1: single MXU pass (M=HW, K=K1P, N=C1P), f32 accumulation ----
    h1 = jnp.dot(x1col_ref[0], w1_ref[...],
                 preferred_element_type=jnp.float32)            # (HW, C1P)
    h1 = jnp.maximum(h1 + b1_ref[...], 0.0)                     # relu; padded
                                                                # channels stay 0
    h1_3d = h1.reshape(H, W, C1P)                               # (16,16,128) f32

    # ---- conv2: 9 accumulated per-tap dots on zero-shifted activations ----
    # dx shifts (axis=1, within-tile sublane shift) are computed once in f32
    # and cast to bf16 (shared by the three dy taps that use them); dy shifts
    # (axis=0) are whole-tile slab shifts on bf16 and essentially free.
    hx = {dx: _shifted(h1_3d, dx, axis=1).astype(jnp.bfloat16)
          for dx in (-1, 0, 1)}

    acc = None
    for t in range(9):
        dy, dx = t // 3 - 1, t % 3 - 1
        tap = _shifted(hx[dx], dy, axis=0).reshape(HW, C1P)     # bf16, lane-dense
        d = jnp.dot(tap, w2_ref[t], preferred_element_type=jnp.float32)
        acc = d if acc is None else acc + d                     # (HW, C2) f32

    h2 = jnp.maximum(acc + b2_ref[...], 0.0)

    # ---- global average pool (classifier is hoisted out of the kernel) ----
    out_ref[0] = jnp.mean(h2, axis=0, keepdims=True)            # (1, C2)


def change_detection_forward(x_nchw, params):
    """x_nchw: (B, 6, H, W) float32 -> (B, num_classes) float32."""
    w1, b1, w2, b2, wl, bl = params
    K1P, C1P = w1.shape
    C2 = w2.shape[2]

    x = jnp.transpose(x_nchw, (0, 2, 3, 1)).astype(jnp.bfloat16)   # NHWC bf16
    B, H, W, Cin = x.shape
    K1 = 9 * Cin

    # conv1 im2col in XLA (layout plumbing): (B, H*W, K1) padded to K1P lanes.
    xp = jnp.pad(x, ((0, 0), (1, 1), (1, 1), (0, 0)))
    cols = [xp[:, dy:dy + H, dx:dx + W, :]
            for dy in range(3) for dx in range(3)]
    x1col = jnp.concatenate(cols, axis=-1).reshape(B, H * W, K1)
    x1col = jnp.pad(x1col, ((0, 0), (0, 0), (0, K1P - K1)))

    kernel = functools.partial(_cdn_kernel, H=H, W=W)
    pooled = pl.pallas_call(
        kernel,
        out_shape=jax.ShapeDtypeStruct((B, 1, C2), jnp.float32),
        grid_spec=pltpu.PrefetchScalarGridSpec(
            num_scalar_prefetch=0,
            grid=(B,),
            in_specs=[
                pl.BlockSpec((1, H * W, K1P), lambda b: (b, 0, 0)),
                pl.BlockSpec((K1P, C1P), lambda b: (0, 0)),
                pl.BlockSpec((1, C1P), lambda b: (0, 0)),
                pl.BlockSpec((9, C1P, C2), lambda b: (0, 0, 0)),
                pl.BlockSpec((1, C2), lambda b: (0, 0)),
            ],
            out_specs=pl.BlockSpec((1, 1, C2), lambda b: (b, 0, 0)),
        ),
        compiler_params=pltpu.CompilerParams(
            dimension_semantics=("parallel",)),
    )(x1col, w1, b1, w2, b2)

    pooled = pooled[:, 0, :]             # (B, C2) lane-dense features
    return pooled @ wl + bl              # classifier hoisted to XLA


def make_params(key, num_classes=1):
    """Deterministic synthetic parameters in both kernel and reference layouts."""
    C_IN, C1, C2 = 6, 64, 128
    C1P = 128            # conv1 out channels padded to a full lane width
    K1, K1P = 9 * C_IN, 128   # conv1 im2col K padded to a full MXU depth
    k1, k2, k3, k4, k5, k6 = jax.random.split(key, 6)

    w1_hwio = 0.05 * jax.random.normal(k1, (3, 3, C_IN, C1), jnp.float32)
    b1 = 0.01 * jax.random.normal(k2, (C1,), jnp.float32)
    w2_hwio = 0.05 * jax.random.normal(k3, (3, 3, C1, C2), jnp.float32)
    b2 = 0.01 * jax.random.normal(k4, (C2,), jnp.float32)
    wl = 0.05 * jax.random.normal(k5, (C2, num_classes), jnp.float32)
    bl = 0.01 * jax.random.normal(k6, (num_classes,), jnp.float32)

    # Kernel layouts: K padded to 128, conv1 out / conv2 in channels padded to 128.
    w1_k = jnp.zeros((K1P, C1P), jnp.float32)
    w1_k = w1_k.at[:K1, :C1].set(w1_hwio.reshape(K1, C1)).astype(jnp.bfloat16)
    b1_k = jnp.zeros((1, C1P), jnp.float32).at[0, :C1].set(b1)
    w2_k = jnp.zeros((9, C1P, C2), jnp.float32)
    w2_k = w2_k.at[:, :C1, :].set(w2_hwio.reshape(9, C1, C2)).astype(jnp.bfloat16)
    b2_k = b2.reshape(1, C2)

    kernel_params = (w1_k, b1_k, w2_k, b2_k, wl, bl)
    ref_params = (w1_hwio, b1, w2_hwio, b2, wl, bl)
    return kernel_params, ref_params


def reference_forward(x_nchw, ref_params):
    """Pure-JAX reference (lax.conv, bf16 operands / f32 accumulation)."""
    w1_hwio, b1, w2_hwio, b2, wl, bl = ref_params
    x = jnp.transpose(x_nchw, (0, 2, 3, 1)).astype(jnp.bfloat16)
    dn = ("NHWC", "HWIO", "NHWC")
    h1 = lax.conv_general_dilated(
        x, w1_hwio.astype(jnp.bfloat16), (1, 1), "SAME",
        dimension_numbers=dn, preferred_element_type=jnp.float32)
    h1 = jnp.maximum(h1 + b1.reshape(1, 1, 1, -1), 0.0)
    h2 = lax.conv_general_dilated(
        h1.astype(jnp.bfloat16), w2_hwio.astype(jnp.bfloat16), (1, 1), "SAME",
        dimension_numbers=dn, preferred_element_type=jnp.float32)
    h2 = jnp.maximum(h2 + b2.reshape(1, 1, 1, -1), 0.0)
    pooled = jnp.mean(h2, axis=(1, 2))            # (B, 128)
    return pooled @ wl + bl


if __name__ == "__main__":
    B, C_IN, H, W = 2, 6, 16, 16   # module requires 6 input channels
    num_classes = 1

    key = jax.random.PRNGKey(0)
    kx, kp = jax.random.split(key)
    x = jax.random.normal(kx, (B, C_IN, H, W), jnp.float32)  # NCHW like PyTorch
    kernel_params, ref_params = make_params(kp, num_classes=num_classes)

    fwd = jax.jit(change_detection_forward)
    out = jax.block_until_ready(fwd(x, kernel_params))

    ref = reference_forward(x, ref_params)
    np.testing.assert_allclose(np.asarray(out), np.asarray(ref),
                               rtol=5e-3, atol=5e-3)

    print("KERNEL_OK")
</pallas_src>

<mosaic_0001>
module attributes {stable_mosaic.version = 11 : i64} {
  func.func @_cdn_kernel(%arg0: i32, %arg1: memref<1x256x128xbf16, #tpu.memory_space<vmem>>, %arg2: memref<128x128xbf16, #tpu.memory_space<vmem>>, %arg3: memref<1x128xf32, #tpu.memory_space<vmem>>, %arg4: memref<9x128x128xbf16, #tpu.memory_space<vmem>>, %arg5: memref<1x128xf32, #tpu.memory_space<vmem>>, %arg6: memref<1x1x128xf32, #tpu.memory_space<vmem>>) attributes {dimension_semantics = [#tpu.dimension_semantics<parallel>], iteration_bounds = array<i64: 2>, scalar_prefetch = 0 : i64, scratch_operands = 0 : i64, tpu.core_type = #tpu.core_type<tc>, window_params = [{transform_indices = @transform_0, window_bounds = array<i64: 1, 256, 128>}, {pipeline_mode = #tpu.pipeline_mode<synchronous>, transform_indices = @transform_1, window_bounds = array<i64: 128, 128>}, {pipeline_mode = #tpu.pipeline_mode<synchronous>, transform_indices = @transform_2, window_bounds = array<i64: 1, 128>}, {pipeline_mode = #tpu.pipeline_mode<synchronous>, transform_indices = @transform_3, window_bounds = array<i64: 9, 128, 128>}, {pipeline_mode = #tpu.pipeline_mode<synchronous>, transform_indices = @transform_4, window_bounds = array<i64: 1, 128>}, {transform_indices = @transform_5, window_bounds = array<i64: 1, 1, 128>}]} {
    %c0 = arith.constant 0 : index
    %c0_0 = arith.constant 0 : index
    %c0_1 = arith.constant 0 : index
    %0 = vector.load %arg1[%c0, %c0_0, %c0_1] : memref<1x256x128xbf16, #tpu.memory_space<vmem>>, vector<1x256x128xbf16>
    %1 = vector.shape_cast %0 : vector<1x256x128xbf16> to vector<256x128xbf16>
    %c0_2 = arith.constant 0 : index
    %c0_3 = arith.constant 0 : index
    %2 = vector.load %arg2[%c0_2, %c0_3] : memref<128x128xbf16, #tpu.memory_space<vmem>>, vector<128x128xbf16>
    %cst = arith.constant dense<0.000000e+00> : vector<256x128xf32>
    %3 = tpu.matmul %1, %2, %cst {dimension_numbers = #tpu.dot_dimension_numbers<[1], [0], [0], [1], [0, 0, 1, 1], [], []>} : vector<256x128xbf16>, vector<128x128xbf16>, vector<256x128xf32> -> vector<256x128xf32>
    %c0_4 = arith.constant 0 : index
    %c0_5 = arith.constant 0 : index
    %4 = vector.load %arg3[%c0_4, %c0_5] : memref<1x128xf32, #tpu.memory_space<vmem>>, vector<1x128xf32>
    %5 = vector.broadcast %4 : vector<1x128xf32> to vector<256x128xf32>
    %6 = arith.addf %3, %5 : vector<256x128xf32>
    %cst_6 = arith.constant 0.000000e+00 : f32
    %7 = vector.broadcast %cst_6 : f32 to vector<256x128xf32>
    %8 = arith.maximumf %6, %7 : vector<256x128xf32>
    %9 = vector.shape_cast %8 : vector<256x128xf32> to vector<16x16x128xf32>
    %cst_7 = arith.constant 0.000000e+00 : f32
    %10 = vector.broadcast %cst_7 : f32 to vector<16x1x128xf32>
    %11 = vector.extract_strided_slice %9 {offsets = [0, 0, 0], sizes = [16, 15, 128], strides = [1, 1, 1]} : vector<16x16x128xf32> to vector<16x15x128xf32>
    %12 = tpu.concatenate %10, %11 in 1 : vector<16x1x128xf32>, vector<16x15x128xf32> -> vector<16x16x128xf32>
    %13 = arith.truncf %12 : vector<16x16x128xf32> to vector<16x16x128xbf16>
    %14 = arith.truncf %9 : vector<16x16x128xf32> to vector<16x16x128xbf16>
    %cst_8 = arith.constant 0.000000e+00 : f32
    %15 = vector.broadcast %cst_8 : f32 to vector<16x1x128xf32>
    %16 = vector.extract_strided_slice %9 {offsets = [0, 1, 0], sizes = [16, 15, 128], strides = [1, 1, 1]} : vector<16x16x128xf32> to vector<16x15x128xf32>
    %17 = tpu.concatenate %16, %15 in 1 : vector<16x15x128xf32>, vector<16x1x128xf32> -> vector<16x16x128xf32>
    %18 = arith.truncf %17 : vector<16x16x128xf32> to vector<16x16x128xbf16>
    %cst_9 = arith.constant 0.000000e+00 : bf16
    %19 = vector.broadcast %cst_9 : bf16 to vector<1x16x128xbf16>
    %20 = vector.extract_strided_slice %13 {offsets = [0, 0, 0], sizes = [15, 16, 128], strides = [1, 1, 1]} : vector<16x16x128xbf16> to vector<15x16x128xbf16>
    %21 = tpu.concatenate %19, %20 in 0 : vector<1x16x128xbf16>, vector<15x16x128xbf16> -> vector<16x16x128xbf16>
    %22 = vector.shape_cast %21 : vector<16x16x128xbf16> to vector<256x128xbf16>
    %c0_10 = arith.constant 0 : index
    %c0_11 = arith.constant 0 : index
    %c0_12 = arith.constant 0 : index
    %23 = vector.load %arg4[%c0_10, %c0_11, %c0_12] : memref<9x128x128xbf16, #tpu.memory_space<vmem>>, vector<1x128x128xbf16>
    %24 = vector.shape_cast %23 : vector<1x128x128xbf16> to vector<128x128xbf16>
    %cst_13 = arith.constant dense<0.000000e+00> : vector<256x128xf32>
    %25 = tpu.matmul %22, %24, %cst_13 {dimension_numbers = #tpu.dot_dimension_numbers<[1], [0], [0], [1], [0, 0, 1, 1], [], []>} : vector<256x128xbf16>, vector<128x128xbf16>, vector<256x128xf32> -> vector<256x128xf32>
    %cst_14 = arith.constant 0.000000e+00 : bf16
    %26 = vector.broadcast %cst_14 : bf16 to vector<1x16x128xbf16>
    %27 = vector.extract_strided_slice %14 {offsets = [0, 0, 0], sizes = [15, 16, 128], strides = [1, 1, 1]} : vector<16x16x128xbf16> to vector<15x16x128xbf16>
    %28 = tpu.concatenate %26, %27 in 0 : vector<1x16x128xbf16>, vector<15x16x128xbf16> -> vector<16x16x128xbf16>
    %29 = vector.shape_cast %28 : vector<16x16x128xbf16> to vector<256x128xbf16>
    %c1 = arith.constant 1 : index
    %c0_15 = arith.constant 0 : index
    %c0_16 = arith.constant 0 : index
    %30 = vector.load %arg4[%c1, %c0_15, %c0_16] : memref<9x128x128xbf16, #tpu.memory_space<vmem>>, vector<1x128x128xbf16>
    %31 = vector.shape_cast %30 : vector<1x128x128xbf16> to vector<128x128xbf16>
    %cst_17 = arith.constant dense<0.000000e+00> : vector<256x128xf32>
    %32 = tpu.matmul %29, %31, %cst_17 {dimension_numbers = #tpu.dot_dimension_numbers<[1], [0], [0], [1], [0, 0, 1, 1], [], []>} : vector<256x128xbf16>, vector<128x128xbf16>, vector<256x128xf32> -> vector<256x128xf32>
    %33 = arith.addf %25, %32 : vector<256x128xf32>
    %cst_18 = arith.constant 0.000000e+00 : bf16
    %34 = vector.broadcast %cst_18 : bf16 to vector<1x16x128xbf16>
    %35 = vector.extract_strided_slice %18 {offsets = [0, 0, 0], sizes = [15, 16, 128], strides = [1, 1, 1]} : vector<16x16x128xbf16> to vector<15x16x128xbf16>
    %36 = tpu.concatenate %34, %35 in 0 : vector<1x16x128xbf16>, vector<15x16x128xbf16> -> vector<16x16x128xbf16>
    %37 = vector.shape_cast %36 : vector<16x16x128xbf16> to vector<256x128xbf16>
    %c2 = arith.constant 2 : index
    %c0_19 = arith.constant 0 : index
    %c0_20 = arith.constant 0 : index
    %38 = vector.load %arg4[%c2, %c0_19, %c0_20] : memref<9x128x128xbf16, #tpu.memory_space<vmem>>, vector<1x128x128xbf16>
    %39 = vector.shape_cast %38 : vector<1x128x128xbf16> to vector<128x128xbf16>
    %cst_21 = arith.constant dense<0.000000e+00> : vector<256x128xf32>
    %40 = tpu.matmul %37, %39, %cst_21 {dimension_numbers = #tpu.dot_dimension_numbers<[1], [0], [0], [1], [0, 0, 1, 1], [], []>} : vector<256x128xbf16>, vector<128x128xbf16>, vector<256x128xf32> -> vector<256x128xf32>
    %41 = arith.addf %33, %40 : vector<256x128xf32>
    %42 = vector.shape_cast %13 : vector<16x16x128xbf16> to vector<256x128xbf16>
    %c3 = arith.constant 3 : index
    %c0_22 = arith.constant 0 : index
    %c0_23 = arith.constant 0 : index
    %43 = vector.load %arg4[%c3, %c0_22, %c0_23] : memref<9x128x128xbf16, #tpu.memory_space<vmem>>, vector<1x128x128xbf16>
    %44 = vector.shape_cast %43 : vector<1x128x128xbf16> to vector<128x128xbf16>
    %cst_24 = arith.constant dense<0.000000e+00> : vector<256x128xf32>
    %45 = tpu.matmul %42, %44, %cst_24 {dimension_numbers = #tpu.dot_dimension_numbers<[1], [0], [0], [1], [0, 0, 1, 1], [], []>} : vector<256x128xbf16>, vector<128x128xbf16>, vector<256x128xf32> -> vector<256x128xf32>
    %46 = arith.addf %41, %45 : vector<256x128xf32>
    %47 = vector.shape_cast %14 : vector<16x16x128xbf16> to vector<256x128xbf16>
    %c4 = arith.constant 4 : index
    %c0_25 = arith.constant 0 : index
    %c0_26 = arith.constant 0 : index
    %48 = vector.load %arg4[%c4, %c0_25, %c0_26] : memref<9x128x128xbf16, #tpu.memory_space<vmem>>, vector<1x128x128xbf16>
    %49 = vector.shape_cast %48 : vector<1x128x128xbf16> to vector<128x128xbf16>
    %cst_27 = arith.constant dense<0.000000e+00> : vector<256x128xf32>
    %50 = tpu.matmul %47, %49, %cst_27 {dimension_numbers = #tpu.dot_dimension_numbers<[1], [0], [0], [1], [0, 0, 1, 1], [], []>} : vector<256x128xbf16>, vector<128x128xbf16>, vector<256x128xf32> -> vector<256x128xf32>
    %51 = arith.addf %46, %50 : vector<256x128xf32>
    %52 = vector.shape_cast %18 : vector<16x16x128xbf16> to vector<256x128xbf16>
    %c5 = arith.constant 5 : index
    %c0_28 = arith.constant 0 : index
    %c0_29 = arith.constant 0 : index
    %53 = vector.load %arg4[%c5, %c0_28, %c0_29] : memref<9x128x128xbf16, #tpu.memory_space<vmem>>, vector<1x128x128xbf16>
    %54 = vector.shape_cast %53 : vector<1x128x128xbf16> to vector<128x128xbf16>
    %cst_30 = arith.constant dense<0.000000e+00> : vector<256x128xf32>
    %55 = tpu.matmul %52, %54, %cst_30 {dimension_numbers = #tpu.dot_dimension_numbers<[1], [0], [0], [1], [0, 0, 1, 1], [], []>} : vector<256x128xbf16>, vector<128x128xbf16>, vector<256x128xf32> -> vector<256x128xf32>
    %56 = arith.addf %51, %55 : vector<256x128xf32>
    %cst_31 = arith.constant 0.000000e+00 : bf16
    %57 = vector.broadcast %cst_31 : bf16 to vector<1x16x128xbf16>
    %58 = vector.extract_strided_slice %13 {offsets = [1, 0, 0], sizes = [15, 16, 128], strides = [1, 1, 1]} : vector<16x16x128xbf16> to vector<15x16x128xbf16>
    %59 = tpu.concatenate %58, %57 in 0 : vector<15x16x128xbf16>, vector<1x16x128xbf16> -> vector<16x16x128xbf16>
    %60 = vector.shape_cast %59 : vector<16x16x128xbf16> to vector<256x128xbf16>
    %c6 = arith.constant 6 : index
    %c0_32 = arith.constant 0 : index
    %c0_33 = arith.constant 0 : index
    %61 = vector.load %arg4[%c6, %c0_32, %c0_33] : memref<9x128x128xbf16, #tpu.memory_space<vmem>>, vector<1x128x128xbf16>
    %62 = vector.shape_cast %61 : vector<1x128x128xbf16> to vector<128x128xbf16>
    %cst_34 = arith.constant dense<0.000000e+00> : vector<256x128xf32>
    %63 = tpu.matmul %60, %62, %cst_34 {dimension_numbers = #tpu.dot_dimension_numbers<[1], [0], [0], [1], [0, 0, 1, 1], [], []>} : vector<256x128xbf16>, vector<128x128xbf16>, vector<256x128xf32> -> vector<256x128xf32>
    %64 = arith.addf %56, %63 : vector<256x128xf32>
    %cst_35 = arith.constant 0.000000e+00 : bf16
    %65 = vector.broadcast %cst_35 : bf16 to vector<1x16x128xbf16>
    %66 = vector.extract_strided_slice %14 {offsets = [1, 0, 0], sizes = [15, 16, 128], strides = [1, 1, 1]} : vector<16x16x128xbf16> to vector<15x16x128xbf16>
    %67 = tpu.concatenate %66, %65 in 0 : vector<15x16x128xbf16>, vector<1x16x128xbf16> -> vector<16x16x128xbf16>
    %68 = vector.shape_cast %67 : vector<16x16x128xbf16> to vector<256x128xbf16>
    %c7 = arith.constant 7 : index
    %c0_36 = arith.constant 0 : index
    %c0_37 = arith.constant 0 : index
    %69 = vector.load %arg4[%c7, %c0_36, %c0_37] : memref<9x128x128xbf16, #tpu.memory_space<vmem>>, vector<1x128x128xbf16>
    %70 = vector.shape_cast %69 : vector<1x128x128xbf16> to vector<128x128xbf16>
    %cst_38 = arith.constant dense<0.000000e+00> : vector<256x128xf32>
    %71 = tpu.matmul %68, %70, %cst_38 {dimension_numbers = #tpu.dot_dimension_numbers<[1], [0], [0], [1], [0, 0, 1, 1], [], []>} : vector<256x128xbf16>, vector<128x128xbf16>, vector<256x128xf32> -> vector<256x128xf32>
    %72 = arith.addf %64, %71 : vector<256x128xf32>
    %cst_39 = arith.constant 0.000000e+00 : bf16
    %73 = vector.broadcast %cst_39 : bf16 to vector<1x16x128xbf16>
    %74 = vector.extract_strided_slice %18 {offsets = [1, 0, 0], sizes = [15, 16, 128], strides = [1, 1, 1]} : vector<16x16x128xbf16> to vector<15x16x128xbf16>
    %75 = tpu.concatenate %74, %73 in 0 : vector<15x16x128xbf16>, vector<1x16x128xbf16> -> vector<16x16x128xbf16>
    %76 = vector.shape_cast %75 : vector<16x16x128xbf16> to vector<256x128xbf16>
    %c8 = arith.constant 8 : index
    %c0_40 = arith.constant 0 : index
    %c0_41 = arith.constant 0 : index
    %77 = vector.load %arg4[%c8, %c0_40, %c0_41] : memref<9x128x128xbf16, #tpu.memory_space<vmem>>, vector<1x128x128xbf16>
    %78 = vector.shape_cast %77 : vector<1x128x128xbf16> to vector<128x128xbf16>
    %cst_42 = arith.constant dense<0.000000e+00> : vector<256x128xf32>
    %79 = tpu.matmul %76, %78, %cst_42 {dimension_numbers = #tpu.dot_dimension_numbers<[1], [0], [0], [1], [0, 0, 1, 1], [], []>} : vector<256x128xbf16>, vector<128x128xbf16>, vector<256x128xf32> -> vector<256x128xf32>
    %80 = arith.addf %72, %79 : vector<256x128xf32>
    %c0_43 = arith.constant 0 : index
    %c0_44 = arith.constant 0 : index
    %81 = vector.load %arg5[%c0_43, %c0_44] : memref<1x128xf32, #tpu.memory_space<vmem>>, vector<1x128xf32>
    %82 = vector.broadcast %81 : vector<1x128xf32> to vector<256x128xf32>
    %83 = arith.addf %80, %82 : vector<256x128xf32>
    %cst_45 = arith.constant 0.000000e+00 : f32
    %84 = vector.broadcast %cst_45 : f32 to vector<256x128xf32>
    %85 = arith.maximumf %83, %84 : vector<256x128xf32>
    %cst_46 = arith.constant dense<0.000000e+00> : vector<128xf32>
    %86 = vector.multi_reduction <add>, %85, %cst_46 [0] : vector<256x128xf32> to vector<128xf32>
    %87 = vector.shape_cast %86 : vector<128xf32> to vector<1x128xf32>
    %cst_47 = arith.constant 2.560000e+02 : f32
    %88 = vector.broadcast %cst_47 : f32 to vector<1x128xf32>
    %89 = arith.divf %87, %88 : vector<1x128xf32>
    %c0_48 = arith.constant 0 : index
    %c0_49 = arith.constant 0 : index
    %c0_50 = arith.constant 0 : index
    %90 = vector.load %arg6[%c0_48, %c0_49, %c0_50] : memref<1x1x128xf32, #tpu.memory_space<vmem>>, vector<1x1x128xf32>
    %91 = vector.shape_cast %90 : vector<1x1x128xf32> to vector<1x128xf32>
    %92 = vector.shape_cast %89 : vector<1x128xf32> to vector<1x1x128xf32>
    tpu.vector_store %arg6[%c0_48, %c0_49, %c0_50], %92 {strides = array<i32>} : memref<1x1x128xf32, #tpu.memory_space<vmem>>, vector<1x1x128xf32>,
    return
  }
  func.func @transform_0(%arg0: i32) -> (i32, i32, i32) {
    %c0_i32 = arith.constant 0 : i32
    %c0_i32_0 = arith.constant 0 : i32
    %c0_i32_1 = arith.constant 0 : i32
    return %arg0, %c0_i32, %c0_i32_0 : i32, i32, i32
  }
  func.func @transform_1(%arg0: i32) -> (i32, i32) {
    %c0_i32 = arith.constant 0 : i32
    %c0_i32_0 = arith.constant 0 : i32
    %c0_i32_1 = arith.constant 0 : i32
    return %c0_i32, %c0_i32_0 : i32, i32
  }
  func.func @transform_2(%arg0: i32) -> (i32, i32) {
    %c0_i32 = arith.constant 0 : i32
    %c0_i32_0 = arith.constant 0 : i32
    %c0_i32_1 = arith.constant 0 : i32
    return %c0_i32, %c0_i32_0 : i32, i32
  }
  func.func @transform_3(%arg0: i32) -> (i32, i32, i32) {
    %c0_i32 = arith.constant 0 : i32
    %c0_i32_0 = arith.constant 0 : i32
    %c0_i32_1 = arith.constant 0 : i32
    %c0_i32_2 = arith.constant 0 : i32
    return %c0_i32, %c0_i32_0, %c0_i32_1 : i32, i32, i32
  }
  func.func @transform_4(%arg0: i32) -> (i32, i32) {
    %c0_i32 = arith.constant 0 : i32
    %c0_i32_0 = arith.constant 0 : i32
    %c0_i32_1 = arith.constant 0 : i32
    return %c0_i32, %c0_i32_0 : i32, i32
  }
  func.func @transform_5(%arg0: i32) -> (i32, i32, i32) {
    %c0_i32 = arith.constant 0 : i32
    %c0_i32_0 = arith.constant 0 : i32
    %c0_i32_1 = arith.constant 0 : i32
    return %arg0, %c0_i32, %c0_i32_0 : i32, i32, i32
  }
}

</mosaic_0001>

<bundles_post_ra>
// kernel: change_detection_forward.1
= control target key start
LH: loop header
LB: loop body
LE: loop exit
PB: predicated region body
PF: predicated region fallthrough
CT: control target
= control target key end

     0   :  { %s4983_s18 = smov 0   ;;  %s5877_s0 = inlined_call_operand.vmem [shape: bf16[2,256,128], index: 0, kind: input, shape index: {}]   ;;  %s5878_s1 = inlined_call_operand.vmem [shape: bf16[128,128], index: 1, kind: input, shape index: {}]   ;;  %s5879_s2 = inlined_call_operand.vmem [shape: f32[1,128], index: 2, kind: input, shape index: {}]   ;;  %s5880_s3 = inlined_call_operand.vmem [shape: bf16[9,128,128], index: 3, kind: input, shape index: {}]   ;;  %s5881_s4 = inlined_call_operand.vmem [shape: f32[1,128], index: 4, kind: input, shape index: {}]   ;;  %s5882_s5 = inlined_call_operand.vmem [shape: f32[2,1,128], index: 5, kind: output, shape index: {}]  }
   0x1 LB: > { %s3303_s19 = sadd.s32 4294967295, %s4949_s18   ;;  %p3307_p0 = scmp.ge.s32.totalorder %s4949_s18, 1  ;;  %s4949_s18 = sphi %s4983_s18, %s15_s18  }
   0x2   : > { %p187_p1 = scmp.lt.s32.totalorder %s4949_s18, 3 }
   0x4   : > { %p188_p2 = pnand %p3307_p0, %p187_p1 }
   0x6   : > { %191 = sbr.rel (%p188_p2) target bundleno = 822 (0x336), region = 40 }
   0xd   : > { %v4847_v0 = vld [vmem:[%s5878_s1] sm:$0xff]   ;;  %p213_p3 = scmp.lt.s32.totalorder %s3303_s19, 1  ;;  %v4848_v1 = vld [vmem:[%s5878_s1 + $0x8] sm:$0xff]   ;;  %v4849_v2 = vld [vmem:[%s5878_s1 + $0x10] sm:$0xff]   ;;  %v5883_v40 = vmov 0   ;;  %vm775_vm0 = vcmask 1046528  }
   0xe   : > { %4101 = vmatprep.subr.bf16.mxu0 %v4847_v0  ;;  %v4850_v3 = vld [vmem:[%s5878_s1 + $0x18] sm:$0xff]   ;;  %v4851_v5 = vld [vmem:[%s5878_s1 + $0x20] sm:$0xff]   ;;  %v4852_v6 = vld [vmem:[%s5878_s1 + $0x28] sm:$0xff]   ;;  %vm646_vm1 = vcmask 1040384   ;;  %vm4952_vm2 = vmmov 1  }
   0xf   : > { %s5897_s19 = smov (!%p213_p3, %s3303_s19), 1  ;;  %4102 = vmatpush3.bf16.msra.mxu0 %v4847_v0  ;;  %v4853_v7 = vld [vmem:[%s5878_s1 + $0x30] sm:$0xff]   ;;  %v4854_v8 = vld [vmem:[%s5878_s1 + $0x38] sm:$0xff]   ;;  %v4872_v9 = vld [vmem:[%s5880_s3 + $0x100] sm:$0xff]  }
  0x10   : > { %4103 = vmatprep.subr.bf16.mxu0 %v4848_v1  ;;  %s3860_s26 = sshll.u32 %s5897_s19, 7  ;;  %4341 = vmatprep.subr.bf16.mxu1 %v4872_v9  ;;  %v4874_v10 = vld [vmem:[%s5880_s3 + $0x108] sm:$0xff]   ;;  %v4871_v11 = vld [vmem:[%s5880_s3 + $0x40] sm:$0xff]   ;;  %v4876_v12 = vld [vmem:[%s5880_s3 + $0x110] sm:$0xff]   ;;  %s220_s30 = scalar_lea.vmem %s5882_s5, %s5897_s19 }
  0x11   : > { %s5006_s29 = scalar_lea.vmem %s5877_s0, %s3860_s26  ;;  %4342 = vmatpush3.bf16.msra.mxu1 %v4872_v9  ;;  %v4873_v15 = vld [vmem:[%s5880_s3 + $0x48] sm:$0xff]   ;;  %v4878_v16 = vld [vmem:[%s5880_s3 + $0x118] sm:$0xff]   ;;  %v4875_v17 = vld [vmem:[%s5880_s3 + $0x50] sm:$0xff]  }
  0x12   : > { %v4855_v4 = vld [vmem:[%s5006_s29] sm:$0xff]   ;;  %4343 = vmatprep.subr.bf16.mxu1 %v4874_v10  ;;  %v4856_v13 = vld [vmem:[%s5006_s29 + $0x8] sm:$0xff]   ;;  %v4857_v14 = vld [vmem:[%s5006_s29 + $0x10] sm:$0xff]  }
  0x13   : > { %4104 = vmatpush3.bf16.msra.mxu0 %v4848_v1  ;;  %4117 = vmatprep.mubr.bf16.mxu0 %v4855_v4  ;;  %v4880_v18 = vld [vmem:[%s5880_s3 + $0x120] sm:$0xff]   ;;  %v4858_v19 = vld [vmem:[%s5006_s29 + $0x18] sm:$0xff]   ;;  %v4882_v22 = vld [vmem:[%s5880_s3 + $0x128] sm:$0xff]  }
  0x14   : > { %4105 = vmatprep.subr.bf16.mxu0 %v4849_v2  ;;  %v4859_v20 = vld [vmem:[%s5006_s29 + $0x20] sm:$0xff]   ;;  %v4877_v21 = vld [vmem:[%s5880_s3 + $0x58] sm:$0xff]   ;;  %v4860_v24 = vld [vmem:[%s5006_s29 + $0x28] sm:$0xff]  }
  0x15   : > { %4344 = vmatpush3.bf16.msra.mxu1 %v4874_v10  ;;  %v4879_v23 = vld [vmem:[%s5880_s3 + $0x60] sm:$0xff]   ;;  %v4861_v25 = vld [vmem:[%s5006_s29 + $0x30] sm:$0xff]   ;;  %v4881_v26 = vld [vmem:[%s5880_s3 + $0x68] sm:$0xff]  }
  0x16   : > { %4345 = vmatprep.subr.bf16.mxu1 %v4876_v12  ;;  %v4862_v27 = vld [vmem:[%s5006_s29 + $0x38] sm:$0xff]   ;;  %v4863_v28 = vld [vmem:[%s5006_s29 + $0x40] sm:$0xff]   ;;  %v4864_v29 = vld [vmem:[%s5006_s29 + $0x48] sm:$0xff]  }
  0x17   : > { %4106 = vmatpush3.bf16.msra.mxu0 %v4849_v2  ;;  %v4865_v30 = vld [vmem:[%s5006_s29 + $0x50] sm:$0xff]   ;;  %v4866_v31 = vld [vmem:[%s5006_s29 + $0x58] sm:$0xff]   ;;  %v4867_v32 = vld [vmem:[%s5006_s29 + $0x60] sm:$0xff]  }
  0x18   : > { %4107 = vmatprep.subr.bf16.mxu0 %v4850_v3  ;;  %v4868_v33 = vld [vmem:[%s5006_s29 + $0x68] sm:$0xff]   ;;  %v4869_v34 = vld [vmem:[%s5006_s29 + $0x70] sm:$0xff]   ;;  %v4870_v35 = vld [vmem:[%s5006_s29 + $0x78] sm:$0xff]  }
  0x19   : > { %4346 = vmatpush3.bf16.msra.mxu1 %v4876_v12  ;;  %v4883_v36 = vld [vmem:[%s5880_s3 + $0x70] sm:$0xff]   ;;  %v4885_v38 = vld [vmem:[%s5880_s3 + $0x78] sm:$0xff]   ;;  %v4887_v41 = vld [vmem:[%s5880_s3 + $0x140] sm:$0xff]  }
  0x1a   : > { %4347 = vmatprep.subr.bf16.mxu1 %v4878_v16  ;;  %v4884_v37 = vld [vmem:[%s5880_s3 + $0x130] sm:$0xff]   ;;  %v4886_v39 = vld [vmem:[%s5880_s3 + $0x138] sm:$0xff]   ;;  %v4891_v42 = vld [vmem:[%s5880_s3] sm:$0xff]  }
  0x1b   : > { %4108 = vmatpush3.bf16.msra.mxu0 %v4850_v3  ;;  %v5097_v43 = vld [vmem:[%s5879_s2] ss:$0 sm:$0xff]  ;;  %vm5327_vm3 = vmpackc.low %vm775_vm0, %vm4952_vm2 }
  0x1c   : > { %4109 = vmatprep.subr.bf16.mxu0 %v4851_v5  ;;  %vm3367_vm4 = vmneg %vm646_vm1 }
  0x1d   : > { %4348 = vmatpush3.bf16.msra.mxu1 %v4878_v16  ;;  %vm5352_vm5 = vmpackc.low %vm4952_vm2, %vm3367_vm4 }
  0x1e   : > { %4349 = vmatprep.subr.bf16.mxu1 %v4880_v18 }
  0x1f   : > { %4110 = vmatpush3.bf16.msra.mxu0 %v4851_v5 }
  0x20   : > { %4111 = vmatprep.subr.bf16.mxu0 %v4852_v6 }
  0x21   : > { %4350 = vmatpush3.bf16.msra.mxu1 %v4880_v18 }
  0x22   : > { %4351 = vmatprep.subr.bf16.mxu1 %v4882_v22 }
  0x23   : > { %4112 = vmatpush3.bf16.msra.mxu0 %v4852_v6  ;;  %v4888_v6 = vld [vmem:[%s5880_s3 + $0x148] sm:$0xff]  }
  0x24   : > { %4113 = vmatprep.subr.bf16.mxu0 %v4853_v7 }
  0x25   : > { %4352 = vmatpush3.bf16.msra.mxu1 %v4882_v22 }
  0x26   : > { %4353 = vmatprep.subr.bf16.mxu1 %v4884_v37 }
  0x27   : > { %4114 = vmatpush3.bf16.msra.mxu0 %v4853_v7  ;;  %v4893_v7 = vld [vmem:[%s5880_s3 + $0x8] sm:$0xff]  }
  0x28   : > { %4115 = vmatprep.subr.bf16.mxu0 %v4854_v8 }
  0x29   : > { %4354 = vmatpush3.bf16.msra.mxu1 %v4884_v37 }
  0x2a   : > { %4355 = vmatprep.subr.bf16.mxu1 %v4886_v39 }
  0x2b   : > { %4116 = vmatpush3.bf16.msra.mxu0 %v4854_v8 }
  0x2c   : > { %4149 = vmatprep.subr.bf16.mxu0 %v4871_v11 }
  0x2d   : > { %4356 = vmatpush3.bf16.msra.mxu1 %v4886_v39  ;;  %v4890_v39 = vld [vmem:[%s5880_s3 + $0x158] sm:$0xff]  }
  0x2e   : > { %4118 = vmatmul.mubr.bf16.vlgmr.msra.gmra.mrb[0].mxu0 %v4856_v13  ;;  %4389 = vmatprep.subr.bf16.mxu1 %v4887_v41 }
  0x2f   : > { %4121 = vmatprep.mubr.bf16.mxu0 %v4857_v14  ;;  %4150 = vmatpush3.bf16.msra.mxu0 %v4871_v11 }
  0x30   : > { %4151 = vmatprep.subr.bf16.mxu0 %v4873_v15 }
  0x33   : > { %4152 = vmatpush3.bf16.msra.mxu0 %v4873_v15 }
  0x34   : > { %4153 = vmatprep.subr.bf16.mxu0 %v4875_v17 }
  0x36   : > { %4122 = vmatmul.mubr.bf16.gmra.mrb[4].mxu0 %v4858_v19 }
  0x37   : > { %4125 = vmatprep.mubr.bf16.mxu0 %v4859_v20  ;;  %4154 = vmatpush3.bf16.msra.mxu0 %v4875_v17 }
  0x38   : > { %4155 = vmatprep.subr.bf16.mxu0 %v4877_v21 }
  0x3b   : > { %4156 = vmatpush3.bf16.msra.mxu0 %v4877_v21 }
  0x3c   : > { %4157 = vmatprep.subr.bf16.mxu0 %v4879_v23 }
  0x3e   : > { %4126 = vmatmul.mubr.bf16.gmra.mrb[8].mxu0 %v4860_v24  ;;  %v4894_v24 = vld [vmem:[%s5880_s3 + $0x10] sm:$0xff]  }
  0x3f   : > { %4129 = vmatprep.mubr.bf16.mxu0 %v4861_v25  ;;  %4158 = vmatpush3.bf16.msra.mxu0 %v4879_v23  ;;  %v4889_v23 = vld [vmem:[%s5880_s3 + $0x150] sm:$0xff]  }
  0x40   : > { %4159 = vmatprep.subr.bf16.mxu0 %v4881_v26 }
  0x43   : > { %4160 = vmatpush3.bf16.msra.mxu0 %v4881_v26 }
  0x44   : > { %4161 = vmatprep.subr.bf16.mxu0 %v4883_v36 }
  0x46   : > { %4130 = vmatmul.mubr.bf16.gmra.mrb[12].mxu0 %v4862_v27 }
  0x47   : > { %4133 = vmatprep.mubr.bf16.mxu0 %v4863_v28  ;;  %4162 = vmatpush3.bf16.msra.mxu0 %v4883_v36 }
  0x48   : > { %4163 = vmatprep.subr.bf16.mxu0 %v4885_v38 }
  0x4b   : > { %4164 = vmatpush3.bf16.msra.mxu0 %v4885_v38 }
  0x4c   : > { %4197 = vmatprep.subr.bf16.mxu0 %v4891_v42 }
  0x4e   : > { %4134 = vmatmul.mubr.bf16.gmra.mrb[16].mxu0 %v4864_v29 }
  0x4f   : > { %4137 = vmatprep.mubr.bf16.mxu0 %v4865_v30 }
  0x56   : > { %4138 = vmatmul.mubr.bf16.gmra.mrb[20].mxu0 %v4866_v31 }
  0x57   : > { %4141 = vmatprep.mubr.bf16.mxu0 %v4867_v32 }
  0x5e   : > { %4142 = vmatmul.mubr.bf16.gmra.mrb[24].mxu0 %v4868_v33 }
  0x5f   : > { %4145 = vmatprep.mubr.bf16.mxu0 %v4869_v34 }
  0x66   : > { %4146 = vmatmul.mubr.bf16.gmra.mrb[28].mxu0 %v4870_v35 }
  0x67   : > { %4165 = vmatprep.mubr.bf16.mxu0 %v5883_v40 }
 0x101   : > { %v4119_v44 = vpop.f32.mrb[0].mxu0 }
 0x102   : > { %v464_v45 = vadd.f32 %v4119_v44, %v5097_v43  ;;  %v455_v46 = vpop.f32.mrb[1].mxu0 }
 0x103   : > { %v456_v47 = vadd.f32 %v5097_v43, %v455_v46  ;;  %v4120_v48 = vpop.f32.mrb[2].mxu0 }
 0x104   : > { %v584_v49 = vmax.f32 %v464_v45, 0.0  ;;  %v467_v50 = vadd.f32 %v4120_v48, %v5097_v43  ;;  %v458_v51 = vpop.f32.mrb[3].mxu0 }
 0x105   : > { %v582_v52 = vmax.f32 %v456_v47, 0.0  ;;  %v459_v53 = vadd.f32 %v5097_v43, %v458_v51 }
 0x106   : > { %v585_v54 = vmax.f32 %v467_v50, 0.0  ;;  %v650_v55 = vrot.slane %v584_v49, 7  ;;  %v779_v57 = vrot.slane %v584_v49, 1 }
 0x107   : > { %v583_v56 = vmax.f32 %v459_v53, 0.0  ;;  %v647_v61 = vrot.slane %v582_v52, 7  ;;  %v776_v2 = vrot.slane %v582_v52, 1 }
 0x108   : > { %v651_v58 = vrot.slane %v585_v54, 7  ;;  %v780_v59 = vrot.slane %v585_v54, 1  ;;  %v5103_v60 = vpack.c.bf16 %v585_v54, %v584_v49 }
 0x109   : > { %v648_v62 = vrot.slane %v583_v56, 7  ;;  %v759_v63 = vpack.c.bf16 %v583_v56, %v582_v52  ;;  %v777_v0 = vrot.slane %v583_v56, 1  ;;  %v4123_v1 = vpop.f32.mrb[4].mxu0 }
 0x10a   : > { %v781_v3 = vsel %vm775_vm0, %v779_v57, %v780_v59  ;;  %v480_v4 = vadd.f32 %v4123_v1, %v5097_v43  ;;  %v471_v5 = vpop.f32.mrb[5].mxu0  ;;  %v652_v8 = vsel %vm646_vm1, %v650_v55, %v651_v58 }
 0x10b   : > { %v5114_v9 = vpack.c.bf16 %v780_v59, %v781_v3  ;;  %v649_v10 = vsel %vm646_vm1, %v647_v61, %v648_v62  ;;  %v472_v11 = vadd.f32 %v5097_v43, %v471_v5  ;;  %v4124_v12 = vpop.f32.mrb[6].mxu0  ;;  %4166 = vmatmul.mubr.bf16.vlgmr.msra.gmra.mrb[32].mxu0 %v759_v63  ;;  %4357 = vmatprep.mubr.bf16.mxu1 %v759_v63  ;;  %v4892_v59 = vld [vmem:[%s5880_s3 + $0x160] sm:$0xff]  }
 0x10c   : > { %v5118_v13 = vpack.c.bf16 %v649_v10, %v647_v61  ;;  %v588_v14 = vmax.f32 %v480_v4, 0.0  ;;  %v483_v15 = vadd.f32 %v4124_v12, %v5097_v43  ;;  %v474_v16 = vpop.f32.mrb[7].mxu0  ;;  %4169 = vmatprep.mubr.bf16.mxu0 %v5103_v60  ;;  %4358 = vmatmul.mubr.bf16.vlgmr.msra.gmra.mrb[0].mxu1 %v5103_v60  ;;  %v778_v17 = vsel %vm775_vm0, %v776_v2, %v777_v0  ;;  %v4897_v61 = vld [vmem:[%s5880_s3 + $0x20] sm:$0xff]  }
 0x10d   : > { %v586_v18 = vmax.f32 %v472_v11, 0.0  ;;  %v475_v19 = vadd.f32 %v5097_v43, %v474_v16  ;;  %4390 = vmatpush3.bf16.msra.mxu1 %v4887_v41  ;;  %4198 = vmatpush3.bf16.msra.mxu0 %v4891_v42  ;;  %v5125_v20 = vpack.c.bf16 %v777_v0, %v778_v17  ;;  %v5127_v21 = vpack.c.bf16 %v652_v8, %v650_v55  ;;  %v4896_v41 = vld [vmem:[%s5880_s3 + $0x18] sm:$0xff]  }
 0x10e   : > { %v589_v22 = vmax.f32 %v483_v15, 0.0  ;;  %4391 = vmatprep.subr.bf16.mxu1 %v4888_v6  ;;  %4199 = vmatprep.subr.bf16.mxu0 %v4893_v7  ;;  %v656_v25 = vrot.slane %v588_v14, 7  ;;  %v785_v26 = vrot.slane %v588_v14, 1  ;;  %v4899_v15 = vld [vmem:[%s5880_s3 + $0x28] sm:$0xff]  }
 0x10f   : > { %v587_v27 = vmax.f32 %v475_v19, 0.0  ;;  %v653_v28 = vrot.slane %v586_v18, 7  ;;  %v782_v32 = vrot.slane %v586_v18, 1 }
 0x110   : > { %v657_v29 = vrot.slane %v589_v22, 7  ;;  %v786_v30 = vrot.slane %v589_v22, 1  ;;  %v5135_v31 = vpack.c.bf16 %v589_v22, %v588_v14  ;;  %v4895_v14 = vld [vmem:[%s5880_s3 + $0x168] sm:$0xff]  }
 0x111   : > { %v654_v33 = vrot.slane %v587_v27, 7  ;;  %v783_v34 = vrot.slane %v587_v27, 1  ;;  %v4127_v35 = vpop.f32.mrb[8].mxu0  ;;  %v5137_v36 = vpack.c.bf16 %v587_v27, %v586_v18  ;;  %4392 = vmatpush3.bf16.msra.mxu1 %v4888_v6  ;;  %4200 = vmatpush3.bf16.msra.mxu0 %v4893_v7 }
 0x112   : > { %v496_v37 = vadd.f32 %v4127_v35, %v5097_v43  ;;  %v487_v38 = vpop.f32.mrb[9].mxu0  ;;  %4393 = vmatprep.subr.bf16.mxu1 %v4889_v23  ;;  %4201 = vmatprep.subr.bf16.mxu0 %v4894_v24  ;;  %v658_v42 = vsel %vm646_vm1, %v656_v25, %v657_v29  ;;  %v787_v44 = vsel %vm775_vm0, %v785_v26, %v786_v30  ;;  %v4898_v35 = vld [vmem:[%s5880_s3 + $0x170] sm:$0xff]  }
 0x113   : > { %v488_v45 = vadd.f32 %v5097_v43, %v487_v38  ;;  %v4128_v46 = vpop.f32.mrb[10].mxu0  ;;  %4170 = vmatmul.mubr.bf16.gmra.mrb[36].mxu0 %v5137_v36  ;;  %4361 = vmatprep.mubr.bf16.mxu1 %v5137_v36  ;;  %v784_v47 = vsel %vm775_vm0, %v782_v32, %v783_v34  ;;  %v655_v48 = vsel %vm646_vm1, %v653_v28, %v654_v33 }
 0x114   : > { %v592_v49 = vmax.f32 %v496_v37, 0.0  ;;  %v499_v50 = vadd.f32 %v4128_v46, %v5097_v43  ;;  %v490_v51 = vpop.f32.mrb[11].mxu0  ;;  %4173 = vmatprep.mubr.bf16.mxu0 %v5135_v31  ;;  %4362 = vmatmul.mubr.bf16.gmra.mrb[4].mxu1 %v5135_v31  ;;  %v5156_v52 = vpack.c.bf16 %v783_v34, %v784_v47  ;;  %v5158_v53 = vpack.c.bf16 %v655_v48, %v653_v28  ;;  %v4900_v37 = vld [vmem:[%s5880_s3 + $0x30] sm:$0xff]  }
 0x115   : > { %v590_v54 = vmax.f32 %v488_v45, 0.0  ;;  %v491_v55 = vadd.f32 %v5097_v43, %v490_v51  ;;  %4394 = vmatpush3.bf16.msra.mxu1 %v4889_v23  ;;  %4202 = vmatpush3.bf16.msra.mxu0 %v4894_v24  ;;  %v5161_v56 = vpack.c.bf16 %v658_v42, %v656_v25  ;;  %v5163_v57 = vpack.c.bf16 %v786_v30, %v787_v44 }
 0x116   : > { %v593_v58 = vmax.f32 %v499_v50, 0.0  ;;  %4395 = vmatprep.subr.bf16.mxu1 %v4890_v39  ;;  %4203 = vmatprep.subr.bf16.mxu0 %v4896_v41  ;;  %v662_v62 = vrot.slane %v592_v49, 7  ;;  %v791_v63 = vrot.slane %v592_v49, 1 }
 0x117   : > { %v591_v0 = vmax.f32 %v491_v55, 0.0  ;;  %v659_v1 = vrot.slane %v590_v54, 7  ;;  %v788_v5 = vrot.slane %v590_v54, 1 }
 0x118   : > { %v663_v2 = vrot.slane %v593_v58, 7  ;;  %v792_v3 = vrot.slane %v593_v58, 1  ;;  %v5171_v4 = vpack.c.bf16 %v593_v58, %v592_v49  ;;  %v4901_v58 = vld [vmem:[%s5880_s3 + $0x178] sm:$0xff]  }
 0x119   : > { %v660_v6 = vrot.slane %v591_v0, 7  ;;  %v789_v7 = vrot.slane %v591_v0, 1  ;;  %v4131_v8 = vpop.f32.mrb[12].mxu0  ;;  %v5173_v10 = vpack.c.bf16 %v591_v0, %v590_v54  ;;  %4396 = vmatpush3.bf16.msra.mxu1 %v4890_v39  ;;  %4204 = vmatpush3.bf16.msra.mxu0 %v4896_v41 }
 0x11a   : > { %v512_v11 = vadd.f32 %v4131_v8, %v5097_v43  ;;  %v503_v12 = vpop.f32.mrb[13].mxu0  ;;  %4397 = vmatprep.subr.bf16.mxu1 %v4892_v59  ;;  %4205 = vmatprep.subr.bf16.mxu0 %v4897_v61  ;;  %v664_v16 = vsel %vm646_vm1, %v662_v62, %v663_v2  ;;  %v793_v17 = vsel %vm775_vm0, %v791_v63, %v792_v3 }
 0x11b   : > { %v504_v18 = vadd.f32 %v5097_v43, %v503_v12  ;;  %v4132_v19 = vpop.f32.mrb[14].mxu0  ;;  %4174 = vmatmul.mubr.bf16.gmra.mrb[40].mxu0 %v5173_v10  ;;  %4365 = vmatprep.mubr.bf16.mxu1 %v5173_v10  ;;  %v790_v22 = vsel %vm775_vm0, %v788_v5, %v789_v7  ;;  %v661_v23 = vsel %vm646_vm1, %v659_v1, %v660_v6 }
 0x11c   : > { %v596_v24 = vmax.f32 %v512_v11, 0.0  ;;  %v515_v25 = vadd.f32 %v4132_v19, %v5097_v43  ;;  %v506_v26 = vpop.f32.mrb[15].mxu0  ;;  %4177 = vmatprep.mubr.bf16.mxu0 %v5171_v4  ;;  %4366 = vmatmul.mubr.bf16.gmra.mrb[8].mxu1 %v5171_v4  ;;  %v5192_v27 = vpack.c.bf16 %v789_v7, %v790_v22  ;;  %v5194_v28 = vpack.c.bf16 %v661_v23, %v659_v1 }
 0x11d   : > { %v594_v29 = vmax.f32 %v504_v18, 0.0  ;;  %v507_v30 = vadd.f32 %v5097_v43, %v506_v26  ;;  %4398 = vmatpush3.bf16.msra.mxu1 %v4892_v59  ;;  %4206 = vmatpush3.bf16.msra.mxu0 %v4897_v61  ;;  %v5197_v32 = vpack.c.bf16 %v664_v16, %v662_v62  ;;  %v5199_v33 = vpack.c.bf16 %v792_v3, %v793_v17  ;;  %v4902_v59 = vld [vmem:[%s5880_s3 + $0x38] sm:$0xff]   ;;  %v5240_v17 = vld [vmem:[%s5880_s3 + $0x180] sm:$0xff]  }
 0x11e   : > { %v597_v34 = vmax.f32 %v515_v25, 0.0  ;;  %4399 = vmatprep.subr.bf16.mxu1 %v4895_v14  ;;  %4207 = vmatprep.subr.bf16.mxu0 %v4899_v15  ;;  %v668_v38 = vrot.slane %v596_v24, 7  ;;  %v797_v39 = vrot.slane %v596_v24, 1  ;;  %v5245_v18 = vld [vmem:[%s5880_s3 + $0x80] sm:$0xff]  }
 0x11f   : > { %v595_v41 = vmax.f32 %v507_v30, 0.0  ;;  %v665_v42 = vrot.slane %v594_v29, 7  ;;  %v794_v47 = vrot.slane %v594_v29, 1 }
 0x120   : > { %v669_v44 = vrot.slane %v597_v34, 7  ;;  %v798_v45 = vrot.slane %v597_v34, 1  ;;  %v5207_v46 = vpack.c.bf16 %v597_v34, %v596_v24 }
 0x121   : > { %v666_v48 = vrot.slane %v595_v41, 7  ;;  %v795_v49 = vrot.slane %v595_v41, 1  ;;  %v4135_v50 = vpop.f32.mrb[16].mxu0  ;;  %v5209_v51 = vpack.c.bf16 %v595_v41, %v594_v29  ;;  %4400 = vmatpush3.bf16.msra.mxu1 %v4895_v14  ;;  %4208 = vmatpush3.bf16.msra.mxu0 %v4899_v15 }
 0x122   : > { %v528_v54 = vadd.f32 %v4135_v50, %v5097_v43  ;;  %v519_v55 = vpop.f32.mrb[17].mxu0  ;;  %4401 = vmatprep.subr.bf16.mxu1 %v4898_v35  ;;  %4209 = vmatprep.subr.bf16.mxu0 %v4900_v37  ;;  %v670_v61 = vsel %vm646_vm1, %v668_v38, %v669_v44  ;;  %v799_v62 = vsel %vm775_vm0, %v797_v39, %v798_v45 }
 0x123   : > { %v520_v63 = vadd.f32 %v5097_v43, %v519_v55  ;;  %v4136_v0 = vpop.f32.mrb[18].mxu0  ;;  %4178 = vmatmul.mubr.bf16.gmra.mrb[44].mxu0 %v5209_v51  ;;  %4369 = vmatprep.mubr.bf16.mxu1 %v5209_v51  ;;  %v796_v1 = vsel %vm775_vm0, %v794_v47, %v795_v49  ;;  %v667_v2 = vsel %vm646_vm1, %v665_v42, %v666_v48 }
 0x124   : > { %v600_v3 = vmax.f32 %v528_v54, 0.0  ;;  %v531_v5 = vadd.f32 %v4136_v0, %v5097_v43  ;;  %v522_v6 = vpop.f32.mrb[19].mxu0  ;;  %4181 = vmatprep.mubr.bf16.mxu0 %v5207_v46  ;;  %4370 = vmatmul.mubr.bf16.gmra.mrb[12].mxu1 %v5207_v46  ;;  %v5228_v7 = vpack.c.bf16 %v795_v49, %v796_v1  ;;  %v5230_v8 = vpack.c.bf16 %v667_v2, %v665_v42 }
 0x125   : > { %v598_v11 = vmax.f32 %v520_v63, 0.0  ;;  %v523_v12 = vadd.f32 %v5097_v43, %v522_v6  ;;  %4402 = vmatpush3.bf16.msra.mxu1 %v4898_v35  ;;  %4210 = vmatpush3.bf16.msra.mxu0 %v4900_v37  ;;  %v5233_v14 = vpack.c.bf16 %v670_v61, %v668_v38  ;;  %v5235_v15 = vpack.c.bf16 %v798_v45, %v799_v62 }
 0x126   : > { %v601_v16 = vmax.f32 %v531_v5, 0.0  ;;  %4403 = vmatprep.subr.bf16.mxu1 %v4901_v58  ;;  %4211 = vmatprep.subr.bf16.mxu0 %v4902_v59  ;;  %v674_v19 = vrot.slane %v600_v3, 7  ;;  %v803_v22 = vrot.slane %v600_v3, 1 }
 0x127   : > { %v599_v23 = vmax.f32 %v523_v12, 0.0  ;;  %v671_v24 = vrot.slane %v598_v11, 7  ;;  %v800_v30 = vrot.slane %v598_v11, 1 }
 0x128   : > { %v675_v25 = vrot.slane %v601_v16, 7  ;;  %v804_v26 = vrot.slane %v601_v16, 1  ;;  %v5247_v29 = vpack.c.bf16 %v601_v16, %v600_v3 }
 0x129   : > { %v672_v34 = vrot.slane %v599_v23, 7  ;;  %v801_v35 = vrot.slane %v599_v23, 1  ;;  %v4139_v37 = vpop.f32.mrb[20].mxu0  ;;  %v5249_v38 = vpack.c.bf16 %v599_v23, %v598_v11  ;;  %4404 = vmatpush3.bf16.msra.mxu1 %v4901_v58  ;;  %4212 = vmatpush3.bf16.msra.mxu0 %v4902_v59 }
 0x12a   : > { %v544_v39 = vadd.f32 %v4139_v37, %v5097_v43  ;;  %v535_v41 = vpop.f32.mrb[21].mxu0  ;;  %4437 = vmatprep.subr.bf16.mxu1 %v5240_v17  ;;  %4245 = vmatprep.subr.bf16.mxu0 %v5245_v18  ;;  %v676_v42 = vsel %vm646_vm1, %v674_v19, %v675_v25  ;;  %v805_v44 = vsel %vm775_vm0, %v803_v22, %v804_v26 }
 0x12b   : > { %v536_v45 = vadd.f32 %v5097_v43, %v535_v41  ;;  %v4140_v47 = vpop.f32.mrb[22].mxu0  ;;  %4182 = vmatmul.mubr.bf16.gmra.mrb[48].mxu0 %v5249_v38  ;;  %4373 = vmatprep.mubr.bf16.mxu1 %v5249_v38  ;;  %v802_v48 = vsel %vm775_vm0, %v800_v30, %v801_v35  ;;  %v673_v49 = vsel %vm646_vm1, %v671_v24, %v672_v34 }
 0x12c   : > { %v604_v50 = vmax.f32 %v544_v39, 0.0  ;;  %v547_v54 = vadd.f32 %v4140_v47, %v5097_v43  ;;  %v538_v55 = vpop.f32.mrb[23].mxu0  ;;  %4185 = vmatprep.mubr.bf16.mxu0 %v5247_v29  ;;  %4374 = vmatmul.mubr.bf16.gmra.mrb[16].mxu1 %v5247_v29  ;;  %v5264_v58 = vpack.c.bf16 %v801_v35, %v802_v48  ;;  %v5266_v59 = vpack.c.bf16 %v673_v49, %v671_v24 }
 0x12d   : > { %v602_v61 = vmax.f32 %v536_v45, 0.0  ;;  %v539_v62 = vadd.f32 %v5097_v43, %v538_v55  ;;  %v5269_v63 = vpack.c.bf16 %v676_v42, %v674_v19  ;;  %v5271_v0 = vpack.c.bf16 %v804_v26, %v805_v44 }
 0x12e   : > { %v605_v1 = vmax.f32 %v547_v54, 0.0  ;;  %v680_v2 = vrot.slane %v604_v50, 7  ;;  %v809_v3 = vrot.slane %v604_v50, 1 }
 0x12f   : > { %v603_v5 = vmax.f32 %v539_v62, 0.0  ;;  %v677_v6 = vrot.slane %v602_v61, 7  ;;  %v806_v22 = vrot.slane %v602_v61, 1 }
 0x130   : > { %v681_v11 = vrot.slane %v605_v1, 7  ;;  %v810_v12 = vrot.slane %v605_v1, 1  ;;  %v5273_v16 = vpack.c.bf16 %v605_v1, %v604_v50 }
 0x131   : > { %v678_v23 = vrot.slane %v603_v5, 7  ;;  %v807_v24 = vrot.slane %v603_v5, 1  ;;  %v4143_v25 = vpop.f32.mrb[24].mxu0  ;;  %v5275_v30 = vpack.c.bf16 %v603_v5, %v602_v61 }
 0x132   : > { %5887 = vst [vmem:[#allocation2_spill] sm:$0xff] %v5273_v16  ;;  %v560_v19 = vadd.f32 %v4143_v25, %v5097_v43  ;;  %v551_v34 = vpop.f32.mrb[25].mxu0  ;;  %v682_v26 = vsel %vm646_vm1, %v680_v2, %v681_v11  ;;  %v811_v35 = vsel %vm775_vm0, %v809_v3, %v810_v12 }
 0x133   : > { %v552_v37 = vadd.f32 %v5097_v43, %v551_v34  ;;  %v4144_v39 = vpop.f32.mrb[26].mxu0  ;;  %4186 = vmatmul.mubr.bf16.gmra.mrb[52].mxu0 %v5275_v30  ;;  %4377 = vmatprep.mubr.bf16.mxu1 %v5275_v30  ;;  %v808_v41 = vsel %vm775_vm0, %v806_v22, %v807_v24  ;;  %v679_v42 = vsel %vm646_vm1, %v677_v6, %v678_v23 }
 0x134   : > { %v608_v44 = vmax.f32 %v560_v19, 0.0  ;;  %v563_v45 = vadd.f32 %v4144_v39, %v5097_v43  ;;  %v554_v47 = vpop.f32.mrb[27].mxu0  ;;  %4189 = vmatprep.mubr.bf16.mxu0 %v5273_v16  ;;  %4378 = vmatmul.mubr.bf16.gmra.mrb[20].mxu1 %v5273_v16  ;;  %v5288_v48 = vpack.c.bf16 %v807_v24, %v808_v41  ;;  %v5290_v49 = vpack.c.bf16 %v679_v42, %v677_v6 }
 0x135   : > { %v606_v50 = vmax.f32 %v552_v37, 0.0  ;;  %v555_v54 = vadd.f32 %v5097_v43, %v554_v47  ;;  %v5293_v55 = vpack.c.bf16 %v682_v26, %v680_v2  ;;  %v5295_v61 = vpack.c.bf16 %v810_v12, %v811_v35 }
 0x136   : > { %v609_v62 = vmax.f32 %v563_v45, 0.0  ;;  %v686_v1 = vrot.slane %v608_v44, 7  ;;  %v815_v3 = vrot.slane %v608_v44, 1 }
 0x137   : > { %v607_v5 = vmax.f32 %v555_v54, 0.0  ;;  %v683_v11 = vrot.slane %v606_v50, 7  ;;  %v812_v24 = vrot.slane %v606_v50, 1 }
 0x138   : > { %v687_v22 = vrot.slane %v609_v62, 7  ;;  %v816_v23 = vrot.slane %v609_v62, 1  ;;  %v5297_v25 = vpack.c.bf16 %v609_v62, %v608_v44 }
 0x139   : > { %v684_v19 = vrot.slane %v607_v5, 7  ;;  %v813_v6 = vrot.slane %v607_v5, 1  ;;  %v4147_v34 = vpop.f32.mrb[28].mxu0  ;;  %v5299_v37 = vpack.c.bf16 %v607_v5, %v606_v50 }
 0x13a   : > { %v576_v2 = vadd.f32 %v4147_v34, %v5097_v43  ;;  %v567_v26 = vpop.f32.mrb[29].mxu0  ;;  %v688_v12 = vsel %vm646_vm1, %v686_v1, %v687_v22  ;;  %v817_v35 = vsel %vm775_vm0, %v815_v3, %v816_v23 }
 0x13b   : > { %5888 = vst [vmem:[#allocation3_spill] sm:$0xff] %v5299_v37  ;;  %v568_v39 = vadd.f32 %v5097_v43, %v567_v26  ;;  %v4148_v41 = vpop.f32.mrb[30].mxu0  ;;  %4190 = vmatmul.mubr.bf16.gmra.mrb[56].mxu0 %v5299_v37  ;;  %4381 = vmatprep.mubr.bf16.mxu1 %v5299_v37  ;;  %v814_v42 = vsel %vm775_vm0, %v812_v24, %v813_v6 }
 0x13c   : > { %v685_v44 = vsel %vm646_vm1, %v683_v11, %v684_v19  ;;  %v612_v45 = vmax.f32 %v576_v2, 0.0  ;;  %v579_v47 = vadd.f32 %v4148_v41, %v5097_v43  ;;  %v570_v50 = vpop.f32.mrb[31].mxu0  ;;  %4193 = vmatprep.mubr.bf16.mxu0 %v5297_v25  ;;  %4382 = vmatmul.mubr.bf16.gmra.mrb[24].mxu1 %v5297_v25  ;;  %v5312_v54 = vpack.c.bf16 %v813_v6, %v814_v42 }
 0x13d   : > { %v5314_v62 = vpack.c.bf16 %v685_v44, %v683_v11  ;;  %v610_v3 = vmax.f32 %v568_v39, 0.0  ;;  %v571_v5 = vadd.f32 %v5097_v43, %v570_v50  ;;  %v5317_v22 = vpack.c.bf16 %v688_v12, %v686_v1 }
 0x13e   : > { %v5319_v24 = vpack.c.bf16 %v816_v23, %v817_v35  ;;  %v613_v19 = vmax.f32 %v579_v47, 0.0  ;;  %v692_v34 = vrot.slane %v612_v45, 7  ;;  %v821_v2 = vrot.slane %v612_v45, 1 }
 0x13f   : > { %v611_v26 = vmax.f32 %v571_v5, 0.0  ;;  %v689_v41 = vrot.slane %v610_v3, 7  ;;  %v818_v6 = vrot.slane %v610_v3, 1  ;;  %v4909_v5 = vld [vmem:[%s5880_s3 + $0x88] sm:$0xff]  }
 0x140   : > { %v693_v40 = vrot.slane %v613_v19, 7  ;;  %v822_v37 = vrot.slane %v613_v19, 1  ;;  %v5321_v16 = vpack.c.bf16 %v613_v19, %v612_v45  ;;  %v5891_v45 = vmov 0   ;;  %v4905_v19 = vld [vmem:[%s5880_s3 + $0x190] sm:$0xff]  }
 0x141   : > { %v690_v42 = vrot.slane %v611_v26, 7  ;;  %v819_v11 = vrot.slane %v611_v26, 1  ;;  %v5323_v44 = vpack.c.bf16 %v611_v26, %v610_v3  ;;  %v4913_v26 = vld [vmem:[%s5880_s3 + $0xa0] sm:$0xff]  }
 0x142   : > { %v823_v1 = vsel %vm775_vm0, %v821_v2, %v822_v37  ;;  %v694_v23 = vsel %vm646_vm1, %v692_v34, %v693_v40  ;;  %v4908_v2 = vld [vmem:[%s5880_s3 + $0x1a0] sm:$0xff]  }
 0x143   : > { %4194 = vmatmul.mubr.bf16.gmra.mrb[60].mxu0 %v5323_v44  ;;  %4385 = vmatprep.mubr.bf16.mxu1 %v5323_v44  ;;  %v820_v12 = vsel %vm775_vm0, %v818_v6, %v819_v11  ;;  %v691_v35 = vsel %vm646_vm1, %v689_v41, %v690_v42  ;;  %v5337_v39 = vpack.c.bf16 %v822_v37, %v823_v1  ;;  %v4904_v37 = vld [vmem:[%s5880_s3 + $0x188] sm:$0xff]   ;;  %v4914_v42 = vld [vmem:[%s5880_s3 + $0x1b0] sm:$0xff]   ;;  %v4917_v1 = vld [vmem:[%s5880_s3 + $0x1b8] sm:$0xff]  }
 0x144   : > { %4386 = vmatmul.mubr.bf16.gmra.mrb[28].mxu1 %v5321_v16  ;;  %4213 = vmatprep.mubr.bf16.mxu0 %v5891_v45  ;;  %v5341_v47 = vpack.c.bf16 %v819_v11, %v820_v12  ;;  %v5343_v50 = vpack.c.bf16 %v691_v35, %v689_v41  ;;  %v5345_v3 = vpack.c.bf16 %v694_v23, %v692_v34  ;;  %v4910_v34 = vld [vmem:[%s5880_s3 + $0x90] sm:$0xff]   ;;  %v4911_v41 = vld [vmem:[%s5880_s3 + $0x1a8] sm:$0xff]   ;;  %v4918_v23 = vld [vmem:[%s5880_s3 + $0xb8] sm:$0xff]  }
 0x145   : > { %4405 = vmatprep.mubr.msk.bf16.mxu1 %vm5327_vm3, %v5125_v20  ;;  %v4915_v6 = vld [vmem:[%s5880_s3 + $0xa8] sm:$0xff]   ;;  %v4916_v11 = vld [vmem:[%s5880_s3 + $0xb0] sm:$0xff]   ;;  %v4919_v12 = vld [vmem:[%s5880_s3 + $0x1c0] sm:$0xff]  }
 0x146   : > { %v4923_v35 = vld [vmem:[%s5880_s3 + $0xc0] sm:$0xff]  }
 0x14b   : > { %4214 = vmatmul.mubr.msk.bf16.vlgmr.msra.gmra.mrb[32].mxu0 %vm5352_vm5, %v5118_v13 }
 0x14c   : > { %4217 = vmatprep.mubr.msk.bf16.mxu0 %vm5352_vm5, %v5127_v21  ;;  %4406 = vmatmul.mubr.msk.bf16.vlgmr.msra.gmra.mrb[0].mxu1 %vm5327_vm3, %v5114_v9 }
 0x14d   : > { %4438 = vmatpush3.bf16.msra.mxu1 %v5240_v17  ;;  %4409 = vmatprep.mubr.msk.bf16.mxu1 %vm5327_vm3, %v5156_v52  ;;  %v4906_v17 = vld [vmem:[%s5880_s3 + $0x198] sm:$0xff]  }
 0x14e   : > { %4439 = vmatprep.subr.bf16.mxu1 %v4904_v37  ;;  %4246 = vmatpush3.bf16.msra.mxu0 %v5245_v18  ;;  %v4912_v18 = vld [vmem:[%s5880_s3 + $0x98] sm:$0xff]  }
 0x14f   : > { %4247 = vmatprep.subr.bf16.mxu0 %v4909_v5 }
 0x151   : > { %4440 = vmatpush3.bf16.msra.mxu1 %v4904_v37  ;;  %v4920_v37 = vld [vmem:[%s5880_s3 + $0x1c8] sm:$0xff]  }
 0x152   : > { %4441 = vmatprep.subr.bf16.mxu1 %v4905_v19  ;;  %4248 = vmatpush3.bf16.msra.mxu0 %v4909_v5  ;;  %v4925_v5 = vld [vmem:[%s5880_s3 + $0xc8] sm:$0xff]  }
 0x153   : > { %4218 = vmatmul.mubr.msk.bf16.gmra.mrb[36].mxu0 %vm5352_vm5, %v5158_v53  ;;  %4249 = vmatprep.subr.bf16.mxu0 %v4910_v34 }
 0x154   : > { %4221 = vmatprep.mubr.msk.bf16.mxu0 %vm5352_vm5, %v5161_v56  ;;  %4410 = vmatmul.mubr.msk.bf16.gmra.mrb[4].mxu1 %vm5327_vm3, %v5163_v57 }
 0x155   : > { %4413 = vmatprep.mubr.msk.bf16.mxu1 %vm5327_vm3, %v5192_v27  ;;  %4442 = vmatpush3.bf16.msra.mxu1 %v4905_v19  ;;  %v4926_v19 = vld [vmem:[%s5880_s3 + $0xd0] sm:$0xff]  }
 0x156   : > { %4443 = vmatprep.subr.bf16.mxu1 %v4906_v17  ;;  %4250 = vmatpush3.bf16.msra.mxu0 %v4910_v34  ;;  %v4922_v34 = vld [vmem:[%s5880_s3 + $0x1d8] sm:$0xff]  }
 0x157   : > { %4251 = vmatprep.subr.bf16.mxu0 %v4912_v18 }
 0x159   : > { %4444 = vmatpush3.bf16.msra.mxu1 %v4906_v17  ;;  %v4928_v17 = vld [vmem:[%s5880_s3 + $0xd8] sm:$0xff]  }
 0x15a   : > { %4445 = vmatprep.subr.bf16.mxu1 %v4908_v2  ;;  %4252 = vmatpush3.bf16.msra.mxu0 %v4912_v18  ;;  %v4924_v18 = vld [vmem:[%s5880_s3 + $0x1e0] sm:$0xff]  }
 0x15b   : > { %4222 = vmatmul.mubr.msk.bf16.gmra.mrb[40].mxu0 %vm5352_vm5, %v5194_v28  ;;  %4253 = vmatprep.subr.bf16.mxu0 %v4913_v26 }
 0x15c   : > { %4225 = vmatprep.mubr.msk.bf16.mxu0 %vm5352_vm5, %v5197_v32  ;;  %4414 = vmatmul.mubr.msk.bf16.gmra.mrb[8].mxu1 %vm5327_vm3, %v5199_v33 }
 0x15d   : > { %4417 = vmatprep.mubr.msk.bf16.mxu1 %vm5327_vm3, %v5228_v7  ;;  %4446 = vmatpush3.bf16.msra.mxu1 %v4908_v2  ;;  %v4929_v2 = vld [vmem:[%s5880_s3 + $0xe0] sm:$0xff]  }
 0x15e   : > { %4447 = vmatprep.subr.bf16.mxu1 %v4911_v41  ;;  %4254 = vmatpush3.bf16.msra.mxu0 %v4913_v26  ;;  %v4927_v26 = vld [vmem:[%s5880_s3 + $0x1e8] sm:$0xff]  }
 0x15f   : > { %4255 = vmatprep.subr.bf16.mxu0 %v4915_v6 }
 0x161   : > { %4448 = vmatpush3.bf16.msra.mxu1 %v4911_v41  ;;  %v4931_v41 = vld [vmem:[%s5880_s3 + $0xe8] sm:$0xff]  }
 0x162   : > { %4449 = vmatprep.subr.bf16.mxu1 %v4914_v42  ;;  %4256 = vmatpush3.bf16.msra.mxu0 %v4915_v6  ;;  %v4930_v6 = vld [vmem:[%s5880_s3 + $0x1f0] sm:$0xff]  }
 0x163   : > { %4226 = vmatmul.mubr.msk.bf16.gmra.mrb[44].mxu0 %vm5352_vm5, %v5230_v8  ;;  %4257 = vmatprep.subr.bf16.mxu0 %v4916_v11 }
 0x164   : > { %4229 = vmatprep.mubr.msk.bf16.mxu0 %vm5352_vm5, %v5233_v14  ;;  %4418 = vmatmul.mubr.msk.bf16.gmra.mrb[12].mxu1 %vm5327_vm3, %v5235_v15 }
 0x165   : > { %4421 = vmatprep.mubr.msk.bf16.mxu1 %vm5327_vm3, %v5264_v58  ;;  %4450 = vmatpush3.bf16.msra.mxu1 %v4914_v42  ;;  %v4932_v42 = vld [vmem:[%s5880_s3 + $0xf0] sm:$0xff]  }
 0x166   : > { %4451 = vmatprep.subr.bf16.mxu1 %v4917_v1  ;;  %4258 = vmatpush3.bf16.msra.mxu0 %v4916_v11  ;;  %v4933_v11 = vld [vmem:[%s5880_s3 + $0x1f8] sm:$0xff]  }
 0x167   : > { %4259 = vmatprep.subr.bf16.mxu0 %v4918_v23 }
 0x169   : > { %4452 = vmatpush3.bf16.msra.mxu1 %v4917_v1  ;;  %v4934_v1 = vld [vmem:[%s5880_s3 + $0xf8] sm:$0xff]  }
 0x16a   : > { %4260 = vmatpush3.bf16.msra.mxu0 %v4918_v23  ;;  %4485 = vmatprep.subr.bf16.mxu1 %v4919_v12  ;;  %v4935_v23 = vld [vmem:[%s5880_s3 + $0x200] sm:$0xff]  }
 0x16b   : > { %4230 = vmatmul.mubr.msk.bf16.gmra.mrb[48].mxu0 %vm5352_vm5, %v5266_v59  ;;  %4293 = vmatprep.subr.bf16.mxu0 %v4923_v35 }
 0x16c   : > { %4233 = vmatprep.mubr.msk.bf16.mxu0 %vm5352_vm5, %v5269_v63  ;;  %4422 = vmatmul.mubr.msk.bf16.gmra.mrb[16].mxu1 %vm5327_vm3, %v5271_v0 }
 0x16d   : > { %4425 = vmatprep.mubr.msk.bf16.mxu1 %vm5327_vm3, %v5288_v48 }
 0x173   : > { %4234 = vmatmul.mubr.msk.bf16.gmra.mrb[52].mxu0 %vm5352_vm5, %v5290_v49 }
 0x174   : > { %4237 = vmatprep.mubr.msk.bf16.mxu0 %vm5352_vm5, %v5293_v55  ;;  %4426 = vmatmul.mubr.msk.bf16.gmra.mrb[20].mxu1 %vm5327_vm3, %v5295_v61 }
 0x175   : > { %4429 = vmatprep.mubr.msk.bf16.mxu1 %vm5327_vm3, %v5312_v54 }
 0x17b   : > { %4238 = vmatmul.mubr.msk.bf16.gmra.mrb[56].mxu0 %vm5352_vm5, %v5314_v62 }
 0x17c   : > { %4241 = vmatprep.mubr.msk.bf16.mxu0 %vm5352_vm5, %v5317_v22  ;;  %4430 = vmatmul.mubr.msk.bf16.gmra.mrb[24].mxu1 %vm5327_vm3, %v5319_v24 }
 0x17d   : > { %4433 = vmatprep.mubr.msk.bf16.mxu1 %vm5327_vm3, %v5341_v47 }
 0x183   : > { %4242 = vmatmul.mubr.msk.bf16.gmra.mrb[60].mxu0 %vm5352_vm5, %v5343_v50 }
 0x184   : > { %4434 = vmatmul.mubr.msk.bf16.gmra.mrb[28].mxu1 %vm5327_vm3, %v5337_v39  ;;  %4261 = vmatprep.mubr.bf16.mxu0 %v5891_v45 }
 0x185   : > { %4453 = vmatprep.mubr.msk.bf16.mxu1 %vm5352_vm5, %v5127_v21 }
 0x18b   : > { %4262 = vmatmul.mubr.msk.bf16.vlgmr.msra.gmra.mrb[32].mxu0 %vm5327_vm3, %v5125_v20  ;;  %v4921_v20 = vld [vmem:[%s5880_s3 + $0x1d0] sm:$0xff]  }
 0x18c   : > { %4265 = vmatprep.mubr.msk.bf16.mxu0 %vm5327_vm3, %v5114_v9  ;;  %4454 = vmatmul.mubr.msk.bf16.vlgmr.msra.gmra.mrb[0].mxu1 %vm5352_vm5, %v5158_v53 }
 0x18d   : > { %4486 = vmatpush3.bf16.msra.mxu1 %v4919_v12  ;;  %4457 = vmatprep.mubr.msk.bf16.mxu1 %vm5352_vm5, %v5161_v56  ;;  %v4936_v12 = vld [vmem:[%s5880_s3 + $0x208] sm:$0xff]  }
 0x18e   : > { %4487 = vmatprep.subr.bf16.mxu1 %v4920_v37  ;;  %4294 = vmatpush3.bf16.msra.mxu0 %v4923_v35 }
 0x18f   : > { %4295 = vmatprep.subr.bf16.mxu0 %v4925_v5 }
 0x191   : > { %4488 = vmatpush3.bf16.msra.mxu1 %v4920_v37 }
 0x192   : > { %4489 = vmatprep.subr.bf16.mxu1 %v4921_v20  ;;  %4296 = vmatpush3.bf16.msra.mxu0 %v4925_v5 }
 0x193   : > { %4266 = vmatmul.mubr.msk.bf16.gmra.mrb[36].mxu0 %vm5327_vm3, %v5156_v52  ;;  %4297 = vmatprep.subr.bf16.mxu0 %v4926_v19 }
 0x194   : > { %4269 = vmatprep.mubr.msk.bf16.mxu0 %vm5327_vm3, %v5163_v57  ;;  %4458 = vmatmul.mubr.msk.bf16.gmra.mrb[4].mxu1 %vm5352_vm5, %v5194_v28 }
 0x195   : > { %4461 = vmatprep.mubr.msk.bf16.mxu1 %vm5352_vm5, %v5197_v32  ;;  %4490 = vmatpush3.bf16.msra.mxu1 %v4921_v20 }
 0x196   : > { %4491 = vmatprep.subr.bf16.mxu1 %v4922_v34  ;;  %4298 = vmatpush3.bf16.msra.mxu0 %v4926_v19 }
 0x197   : > { %4299 = vmatprep.subr.bf16.mxu0 %v4928_v17 }
 0x199   : > { %4492 = vmatpush3.bf16.msra.mxu1 %v4922_v34 }
 0x19a   : > { %4493 = vmatprep.subr.bf16.mxu1 %v4924_v18  ;;  %4300 = vmatpush3.bf16.msra.mxu0 %v4928_v17 }
 0x19b   : > { %4270 = vmatmul.mubr.msk.bf16.gmra.mrb[40].mxu0 %vm5327_vm3, %v5192_v27  ;;  %4301 = vmatprep.subr.bf16.mxu0 %v4929_v2 }
 0x19c   : > { %4273 = vmatprep.mubr.msk.bf16.mxu0 %vm5327_vm3, %v5199_v33  ;;  %4462 = vmatmul.mubr.msk.bf16.gmra.mrb[8].mxu1 %vm5352_vm5, %v5230_v8 }
 0x19d   : > { %4465 = vmatprep.mubr.msk.bf16.mxu1 %vm5352_vm5, %v5233_v14  ;;  %4494 = vmatpush3.bf16.msra.mxu1 %v4924_v18 }
 0x19e   : > { %4495 = vmatprep.subr.bf16.mxu1 %v4927_v26  ;;  %4302 = vmatpush3.bf16.msra.mxu0 %v4929_v2 }
 0x19f   : > { %4303 = vmatprep.subr.bf16.mxu0 %v4931_v41 }
 0x1a1   : > { %4496 = vmatpush3.bf16.msra.mxu1 %v4927_v26 }
 0x1a2   : > { %4497 = vmatprep.subr.bf16.mxu1 %v4930_v6  ;;  %4304 = vmatpush3.bf16.msra.mxu0 %v4931_v41 }
 0x1a3   : > { %4274 = vmatmul.mubr.msk.bf16.gmra.mrb[44].mxu0 %vm5327_vm3, %v5228_v7  ;;  %4305 = vmatprep.subr.bf16.mxu0 %v4932_v42 }
 0x1a4   : > { %4277 = vmatprep.mubr.msk.bf16.mxu0 %vm5327_vm3, %v5235_v15  ;;  %4466 = vmatmul.mubr.msk.bf16.gmra.mrb[12].mxu1 %vm5352_vm5, %v5266_v59 }
 0x1a5   : > { %4469 = vmatprep.mubr.msk.bf16.mxu1 %vm5352_vm5, %v5269_v63  ;;  %4498 = vmatpush3.bf16.msra.mxu1 %v4930_v6 }
 0x1a6   : > { %4499 = vmatprep.subr.bf16.mxu1 %v4933_v11  ;;  %4306 = vmatpush3.bf16.msra.mxu0 %v4932_v42 }
 0x1a7   : > { %4307 = vmatprep.subr.bf16.mxu0 %v4934_v1 }
 0x1a9   : > { %4500 = vmatpush3.bf16.msra.mxu1 %v4933_v11 }
 0x1aa   : > { %4308 = vmatpush3.bf16.msra.mxu0 %v4934_v1  ;;  %4533 = vmatprep.subr.bf16.mxu1 %v4935_v23 }
 0x1ab   : > { %4278 = vmatmul.mubr.msk.bf16.gmra.mrb[48].mxu0 %vm5327_vm3, %v5264_v58 }
 0x1ac   : > { %4281 = vmatprep.mubr.msk.bf16.mxu0 %vm5327_vm3, %v5271_v0  ;;  %4470 = vmatmul.mubr.msk.bf16.gmra.mrb[16].mxu1 %vm5352_vm5, %v5290_v49 }
 0x1ad   : > { %4473 = vmatprep.mubr.msk.bf16.mxu1 %vm5352_vm5, %v5293_v55 }
 0x1b3   : > { %4282 = vmatmul.mubr.msk.bf16.gmra.mrb[52].mxu0 %vm5327_vm3, %v5288_v48 }
 0x1b4   : > { %4285 = vmatprep.mubr.msk.bf16.mxu0 %vm5327_vm3, %v5295_v61  ;;  %4474 = vmatmul.mubr.msk.bf16.gmra.mrb[20].mxu1 %vm5352_vm5, %v5314_v62 }
 0x1b5   : > { %4477 = vmatprep.mubr.msk.bf16.mxu1 %vm5352_vm5, %v5317_v22 }
 0x1bb   : > { %4286 = vmatmul.mubr.msk.bf16.gmra.mrb[56].mxu0 %vm5327_vm3, %v5312_v54 }
 0x1bc   : > { %4289 = vmatprep.mubr.msk.bf16.mxu0 %vm5327_vm3, %v5319_v24  ;;  %4478 = vmatmul.mubr.msk.bf16.gmra.mrb[24].mxu1 %vm5352_vm5, %v5343_v50 }
 0x1bd   : > { %4481 = vmatprep.mubr.msk.bf16.mxu1 %vm5352_vm5, %v5345_v3 }
 0x1c3   : > { %4290 = vmatmul.mubr.msk.bf16.gmra.mrb[60].mxu0 %vm5327_vm3, %v5341_v47 }
 0x1c4   : > { %4309 = vmatprep.mubr.msk.bf16.mxu0 %vm5352_vm5, %v5118_v13  ;;  %4482 = vmatmul.mubr.bf16.gmra.mrb[28].mxu1 %v5891_v45  ;;  %v4938_v13 = vld [vmem:[%s5880_s3 + $0x218] sm:$0xff]  }
 0x1c5   : > { %4501 = vmatprep.mubr.bf16.mxu1 %v5103_v60  ;;  %v4937_v60 = vld [vmem:[%s5880_s3 + $0x210] sm:$0xff]  }
 0x1cb   : > { %4310 = vmatmul.mubr.msk.bf16.vlgmr.msra.gmra.mrb[32].mxu0 %vm5352_vm5, %v5127_v21  ;;  %v4939_v21 = vld [vmem:[%s5880_s3 + $0x220] sm:$0xff]  }
 0x1cc   : > { %4313 = vmatprep.mubr.msk.bf16.mxu0 %vm5352_vm5, %v5158_v53  ;;  %4502 = vmatmul.mubr.bf16.vlgmr.msra.gmra.mrb[0].mxu1 %v5137_v36  ;;  %v4941_v36 = vld [vmem:[%s5880_s3 + $0x230] sm:$0xff]   ;;  %v4942_v53 = vld [vmem:[%s5880_s3 + $0x238] sm:$0xff]  }
 0x1cd   : > { %4534 = vmatpush3.bf16.msra.mxu1 %v4935_v23  ;;  %4505 = vmatprep.mubr.bf16.mxu1 %v5135_v31  ;;  %v4940_v31 = vld [vmem:[%s5880_s3 + $0x228] sm:$0xff]  }
 0x1ce   : > { %4535 = vmatprep.subr.bf16.mxu1 %v4936_v12 }
 0x1d1   : > { %4536 = vmatpush3.bf16.msra.mxu1 %v4936_v12 }
 0x1d2   : > { %4537 = vmatprep.subr.bf16.mxu1 %v4937_v60 }
 0x1d3   : > { %4314 = vmatmul.mubr.msk.bf16.gmra.mrb[36].mxu0 %vm5352_vm5, %v5161_v56  ;;  %v5894_v56 = vld [vmem:[#allocation2_spill] sm:$0xff] }
 0x1d4   : > { %4317 = vmatprep.mubr.msk.bf16.mxu0 %vm5352_vm5, %v5194_v28  ;;  %4506 = vmatmul.mubr.bf16.gmra.mrb[4].mxu1 %v5173_v10 }
 0x1d5   : > { %4509 = vmatprep.mubr.bf16.mxu1 %v5171_v4  ;;  %4538 = vmatpush3.bf16.msra.mxu1 %v4937_v60  ;;  %v5895_v4 = vld [vmem:[#allocation3_spill] sm:$0xff] }
 0x1d6   : > { %4539 = vmatprep.subr.bf16.mxu1 %v4938_v13 }
 0x1d9   : > { %4540 = vmatpush3.bf16.msra.mxu1 %v4938_v13 }
 0x1da   : > { %4541 = vmatprep.subr.bf16.mxu1 %v4939_v21 }
 0x1db   : > { %4318 = vmatmul.mubr.msk.bf16.gmra.mrb[40].mxu0 %vm5352_vm5, %v5197_v32 }
 0x1dc   : > { %4321 = vmatprep.mubr.msk.bf16.mxu0 %vm5352_vm5, %v5230_v8  ;;  %4510 = vmatmul.mubr.bf16.gmra.mrb[8].mxu1 %v5209_v51 }
 0x1dd   : > { %4513 = vmatprep.mubr.bf16.mxu1 %v5207_v46  ;;  %4542 = vmatpush3.bf16.msra.mxu1 %v4939_v21 }
 0x1de   : > { %4543 = vmatprep.subr.bf16.mxu1 %v4940_v31 }
 0x1e1   : > { %4544 = vmatpush3.bf16.msra.mxu1 %v4940_v31 }
 0x1e2   : > { %4545 = vmatprep.subr.bf16.mxu1 %v4941_v36 }
 0x1e3   : > { %4322 = vmatmul.mubr.msk.bf16.gmra.mrb[44].mxu0 %vm5352_vm5, %v5233_v14 }
 0x1e4   : > { %4325 = vmatprep.mubr.msk.bf16.mxu0 %vm5352_vm5, %v5266_v59  ;;  %4514 = vmatmul.mubr.bf16.gmra.mrb[12].mxu1 %v5249_v38 }
 0x1e5   : > { %4517 = vmatprep.mubr.bf16.mxu1 %v5247_v29  ;;  %4546 = vmatpush3.bf16.msra.mxu1 %v4941_v36 }
 0x1e6   : > { %4547 = vmatprep.subr.bf16.mxu1 %v4942_v53 }
 0x1e9   : > { %4548 = vmatpush3.bf16.msra.mxu1 %v4942_v53 }
 0x1eb   : > { %4326 = vmatmul.mubr.msk.bf16.gmra.mrb[48].mxu0 %vm5352_vm5, %v5269_v63 }
 0x1ec   : > { %4329 = vmatprep.mubr.msk.bf16.mxu0 %vm5352_vm5, %v5290_v49  ;;  %4518 = vmatmul.mubr.bf16.gmra.mrb[16].mxu1 %v5275_v30 }
 0x1ed   : > { %4521 = vmatprep.mubr.bf16.mxu1 %v5894_v56 }
 0x1f3   : > { %4330 = vmatmul.mubr.msk.bf16.gmra.mrb[52].mxu0 %vm5352_vm5, %v5293_v55 }
 0x1f4   : > { %4333 = vmatprep.mubr.msk.bf16.mxu0 %vm5352_vm5, %v5314_v62  ;;  %4522 = vmatmul.mubr.bf16.gmra.mrb[20].mxu1 %v5895_v4 }
 0x1f5   : > { %4525 = vmatprep.mubr.bf16.mxu1 %v5297_v25 }
 0x1fb   : > { %4334 = vmatmul.mubr.msk.bf16.gmra.mrb[56].mxu0 %vm5352_vm5, %v5317_v22 }
 0x1fc   : > { %4337 = vmatprep.mubr.msk.bf16.mxu0 %vm5352_vm5, %v5343_v50  ;;  %4526 = vmatmul.mubr.bf16.gmra.mrb[24].mxu1 %v5323_v44 }
 0x1fd   : > { %4529 = vmatprep.mubr.bf16.mxu1 %v5321_v16 }
 0x203   : > { %4338 = vmatmul.mubr.msk.bf16.gmra.mrb[60].mxu0 %vm5352_vm5, %v5345_v3 }
 0x204   : > { %4530 = vmatmul.mubr.bf16.gmra.mrb[28].mxu1 %v5891_v45 }
 0x205   : > { %4549 = vmatprep.mubr.msk.bf16.mxu1 %vm5327_vm3, %v5114_v9 }
 0x20c   : > { %4550 = vmatmul.mubr.msk.bf16.vlgmr.msra.gmra.mrb[0].mxu1 %vm5327_vm3, %v5156_v52 }
 0x20d   : > { %4553 = vmatprep.mubr.msk.bf16.mxu1 %vm5327_vm3, %v5163_v57 }
 0x214   : > { %4554 = vmatmul.mubr.msk.bf16.gmra.mrb[4].mxu1 %vm5327_vm3, %v5192_v27 }
 0x215   : > { %4557 = vmatprep.mubr.msk.bf16.mxu1 %vm5327_vm3, %v5199_v33 }
 0x21c   : > { %4558 = vmatmul.mubr.msk.bf16.gmra.mrb[8].mxu1 %vm5327_vm3, %v5228_v7 }
 0x21d   : > { %4561 = vmatprep.mubr.msk.bf16.mxu1 %vm5327_vm3, %v5235_v15 }
 0x224   : > { %4562 = vmatmul.mubr.msk.bf16.gmra.mrb[12].mxu1 %vm5327_vm3, %v5264_v58 }
 0x225   : > { %4565 = vmatprep.mubr.msk.bf16.mxu1 %vm5327_vm3, %v5271_v0 }
 0x22c   : > { %4566 = vmatmul.mubr.msk.bf16.gmra.mrb[16].mxu1 %vm5327_vm3, %v5288_v48 }
 0x22d   : > { %4569 = vmatprep.mubr.msk.bf16.mxu1 %vm5327_vm3, %v5295_v61 }
 0x234   : > { %4570 = vmatmul.mubr.msk.bf16.gmra.mrb[20].mxu1 %vm5327_vm3, %v5312_v54 }
 0x235   : > { %4573 = vmatprep.mubr.msk.bf16.mxu1 %vm5327_vm3, %v5319_v24 }
 0x23c   : > { %4574 = vmatmul.mubr.msk.bf16.gmra.mrb[24].mxu1 %vm5327_vm3, %v5341_v47 }
 0x23d   : > { %4577 = vmatprep.mubr.msk.bf16.mxu1 %vm5327_vm3, %v5337_v39 }
 0x244   : > { %4578 = vmatmul.mubr.bf16.gmra.mrb[28].mxu1 %v5891_v45  ;;  %v5813_v45 = vld [vmem:[%s5881_s4] ss:$0 sm:$0xff] }
 0x29e   : > { %v4311_v9 = vpop.f32.mrb[32].mxu0 }
 0x29f   : > { %v1696_v52 = vpop.f32.mrb[33].mxu0 }
 0x2a0   : > { %v4312_v57 = vpop.f32.mrb[34].mxu0 }
 0x2a1   : > { %v1699_v10 = vpop.f32.mrb[35].mxu0 }
 0x2a6   : > { %v4315_v27 = vpop.f32.mrb[36].mxu0 }
 0x2a7   : > { %v1712_v28 = vpop.f32.mrb[37].mxu0 }
 0x2a8   : > { %v4316_v32 = vpop.f32.mrb[38].mxu0 }
 0x2a9   : > { %v1715_v33 = vpop.f32.mrb[39].mxu0 }
 0x2ae   : > { %v4319_v46 = vpop.f32.mrb[40].mxu0 }
 0x2af   : > { %v5764_v51 = vpop.f32.mrb[41].mxu0 }
 0x2b0   : > { %v5766_v7 = vpop.f32.mrb[42].mxu0 }
 0x2b1   : > { %v5768_v8 = vpop.f32.mrb[43].mxu0 }
 0x2b6   : > { %v5770_v14 = vpop.f32.mrb[44].mxu0 }
 0x2b7   : > { %v5772_v15 = vpop.f32.mrb[45].mxu0 }
 0x2b8   : > { %v5774_v29 = vpop.f32.mrb[46].mxu0 }
 0x2b9   : > { %v5776_v38 = vpop.f32.mrb[47].mxu0 }
 0x2be   : > { %v5778_v58 = vpop.f32.mrb[48].mxu0 }
 0x2bf   : > { %v5780_v59 = vpop.f32.mrb[49].mxu0 }
 0x2c0   : > { %v5782_v63 = vpop.f32.mrb[50].mxu0 }
 0x2c1   : > { %v5784_v0 = vpop.f32.mrb[51].mxu0 }
 0x2c6   : > { %v5786_v16 = vpop.f32.mrb[52].mxu0 }
 0x2c7   : > { %v5788_v30 = vpop.f32.mrb[53].mxu0 }
 0x2c8   : > { %v5790_v48 = vpop.f32.mrb[54].mxu0 }
 0x2c9   : > { %v5792_v49 = vpop.f32.mrb[55].mxu0 }
 0x2ce   : > { %v5794_v55 = vpop.f32.mrb[56].mxu0 }
 0x2cf   : > { %v5796_v61 = vpop.f32.mrb[57].mxu0 }
 0x2d0   : > { %v5798_v25 = vpop.f32.mrb[58].mxu0 }
 0x2d1   : > { %v5800_v54 = vpop.f32.mrb[59].mxu0 }
 0x2d6   : > { %v5802_v62 = vpop.f32.mrb[60].mxu0 }
 0x2d7   : > { %v5804_v22 = vpop.f32.mrb[61].mxu0 }
 0x2d8   : > { %v5806_v24 = vpop.f32.mrb[62].mxu0 }
 0x2d9   : > { %v5808_v44 = vpop.f32.mrb[63].mxu0 }
 0x2df   : > { %v4551_v43 = vpop.f32.mrb[0].mxu1 }
 0x2e0   : > { %v4581_v39 = vadd.f32 %v4551_v43, %v4311_v9  ;;  %v2986_v47 = vpop.f32.mrb[1].mxu1 }
 0x2e1   : > { %v4582_v50 = vadd.f32 %v2986_v47, %v1696_v52  ;;  %v4552_v3 = vpop.f32.mrb[2].mxu1 }
 0x2e2   : > { %v4583_v40 = vadd.f32 %v4552_v3, %v4312_v57  ;;  %v2989_v35 = vpop.f32.mrb[3].mxu1  ;;  %v3154_v20 = vadd.f32 %v4581_v39, %v5813_v45 }
 0x2e3   : > { %v3152_v37 = vadd.f32 %v4582_v50, %v5813_v45  ;;  %v4584_v5 = vadd.f32 %v2989_v35, %v1699_v10 }
 0x2e4   : > { %v3155_v17 = vadd.f32 %v4583_v40, %v5813_v45  ;;  %v3186_v6 = vmax.f32 %v3154_v20, 0.0 }
 0x2e5   : > { %v3153_v19 = vadd.f32 %v4584_v5, %v5813_v45  ;;  %v3184_v34 = vmax.f32 %v3152_v37, 0.0 }
 0x2e6   : > { %v3187_v60 = vmax.f32 %v3155_v17, 0.0 }
 0x2e7   : > { %v3185_v18 = vmax.f32 %v3153_v19, 0.0  ;;  %v4555_v2 = vpop.f32.mrb[4].mxu1 }
 0x2e8   : > { %v4585_v26 = vadd.f32 %v4555_v2, %v4315_v27  ;;  %v3002_v41 = vpop.f32.mrb[5].mxu1 }
 0x2e9   : > { %v3216_v42 = vadd.f32 %v3185_v18, %v3184_v34  ;;  %v4586_v11 = vadd.f32 %v3002_v41, %v1712_v28  ;;  %v4556_v1 = vpop.f32.mrb[6].mxu1 }
 0x2ea   : > { %v4587_v23 = vadd.f32 %v4556_v1, %v4316_v32  ;;  %v3005_v12 = vpop.f32.mrb[7].mxu1  ;;  %v3158_v36 = vadd.f32 %v4585_v26, %v5813_v45 }
 0x2eb   : > { %v3217_v13 = vadd.f32 %v3216_v42, %v3186_v6  ;;  %v3156_v21 = vadd.f32 %v4586_v11, %v5813_v45  ;;  %v4588_v31 = vadd.f32 %v3005_v12, %v1715_v33 }
 0x2ec   : > { %v3159_v52 = vadd.f32 %v4587_v23, %v5813_v45  ;;  %v3190_v32 = vmax.f32 %v3158_v36, 0.0 }
 0x2ed   : > { %v3188_v53 = vmax.f32 %v3156_v21, 0.0  ;;  %v3218_v56 = vadd.f32 %v3217_v13, %v3187_v60  ;;  %v3157_v4 = vadd.f32 %v4588_v31, %v5813_v45 }
 0x2ee   : > { %v3191_v3 = vmax.f32 %v3159_v52, 0.0 }
 0x2ef   : > { %v3219_v9 = vadd.f32 %v3218_v56, %v3188_v53  ;;  %v3189_v57 = vmax.f32 %v3157_v4, 0.0  ;;  %v4559_v10 = vpop.f32.mrb[8].mxu1 }
 0x2f0   : > { %v4589_v27 = vadd.f32 %v4559_v10, %v4319_v46  ;;  %v3018_v28 = vpop.f32.mrb[9].mxu1 }
 0x2f1   : > { %v3220_v43 = vadd.f32 %v3219_v9, %v3189_v57  ;;  %v4590_v39 = vadd.f32 %v3018_v28, %v5764_v51  ;;  %v4560_v47 = vpop.f32.mrb[10].mxu1 }
 0x2f2   : > { %v4591_v33 = vadd.f32 %v4560_v47, %v5766_v7  ;;  %v3021_v50 = vpop.f32.mrb[11].mxu1  ;;  %v3162_v5 = vadd.f32 %v4589_v27, %v5813_v45 }
 0x2f3   : > { %v3221_v40 = vadd.f32 %v3220_v43, %v3190_v32  ;;  %v3160_v35 = vadd.f32 %v4590_v39, %v5813_v45  ;;  %v4592_v37 = vadd.f32 %v3021_v50, %v5768_v8 }
 0x2f4   : > { %v3163_v17 = vadd.f32 %v4591_v33, %v5813_v45  ;;  %v3194_v26 = vmax.f32 %v3162_v5, 0.0 }
 0x2f5   : > { %v3192_v20 = vmax.f32 %v3160_v35, 0.0  ;;  %v3222_v19 = vadd.f32 %v3221_v40, %v3191_v3  ;;  %v3161_v46 = vadd.f32 %v4592_v37, %v5813_v45 }
 0x2f6   : > { %v3195_v1 = vmax.f32 %v3163_v17, 0.0 }
 0x2f7   : > { %v3223_v34 = vadd.f32 %v3222_v19, %v3192_v20  ;;  %v3193_v51 = vmax.f32 %v3161_v46, 0.0  ;;  %v4563_v18 = vpop.f32.mrb[12].mxu1 }
 0x2f8   : > { %v4593_v7 = vadd.f32 %v4563_v18, %v5770_v14  ;;  %v3034_v2 = vpop.f32.mrb[13].mxu1 }
 0x2f9   : > { %v3224_v41 = vadd.f32 %v3223_v34, %v3193_v51  ;;  %v4594_v6 = vadd.f32 %v3034_v2, %v5772_v15  ;;  %v4564_v42 = vpop.f32.mrb[14].mxu1 }
 0x2fa   : > { %v4595_v8 = vadd.f32 %v4564_v42, %v5774_v29  ;;  %v3037_v11 = vpop.f32.mrb[15].mxu1  ;;  %v3166_v13 = vadd.f32 %v4593_v7, %v5813_v45 }
 0x2fb   : > { %v3225_v23 = vadd.f32 %v3224_v41, %v3194_v26  ;;  %v3164_v12 = vadd.f32 %v4594_v6, %v5813_v45  ;;  %v4596_v60 = vadd.f32 %v3037_v11, %v5776_v38 }
 0x2fc   : > { %v3167_v53 = vadd.f32 %v4595_v8, %v5813_v45  ;;  %v3198_v9 = vmax.f32 %v3166_v13, 0.0 }
 0x2fd   : > { %v3196_v21 = vmax.f32 %v3164_v12, 0.0  ;;  %v3226_v31 = vadd.f32 %v3225_v23, %v3195_v1  ;;  %v3165_v14 = vadd.f32 %v4596_v60, %v5813_v45 }
 0x2fe   : > { %v3199_v28 = vmax.f32 %v3167_v53, 0.0 }
 0x2ff   : > { %v3227_v36 = vadd.f32 %v3226_v31, %v3196_v21  ;;  %v3197_v15 = vmax.f32 %v3165_v14, 0.0  ;;  %v4567_v56 = vpop.f32.mrb[16].mxu1 }
 0x300   : > { %v4597_v29 = vadd.f32 %v4567_v56, %v5778_v58  ;;  %v3050_v4 = vpop.f32.mrb[17].mxu1 }
 0x301   : > { %v3228_v52 = vadd.f32 %v3227_v36, %v3197_v15  ;;  %v4598_v57 = vadd.f32 %v3050_v4, %v5780_v59  ;;  %v4568_v10 = vpop.f32.mrb[18].mxu1 }
 0x302   : > { %v4599_v38 = vadd.f32 %v4568_v10, %v5782_v63  ;;  %v3053_v27 = vpop.f32.mrb[19].mxu1  ;;  %v3170_v47 = vadd.f32 %v4597_v29, %v5813_v45 }
 0x303   : > { %v3229_v32 = vadd.f32 %v3228_v52, %v3198_v9  ;;  %v3168_v43 = vadd.f32 %v4598_v57, %v5813_v45  ;;  %v4600_v39 = vadd.f32 %v3053_v27, %v5784_v0 }
 0x304   : > { %v3171_v40 = vadd.f32 %v4599_v38, %v5813_v45  ;;  %v3202_v5 = vmax.f32 %v3170_v47, 0.0 }
 0x305   : > { %v3200_v33 = vmax.f32 %v3168_v43, 0.0  ;;  %v3230_v50 = vadd.f32 %v3229_v32, %v3199_v28  ;;  %v3169_v58 = vadd.f32 %v4600_v39, %v5813_v45 }
 0x306   : > { %v3203_v17 = vmax.f32 %v3171_v40, 0.0 }
 0x307   : > { %v3231_v3 = vadd.f32 %v3230_v50, %v3200_v33  ;;  %v3201_v59 = vmax.f32 %v3169_v58, 0.0  ;;  %v4571_v35 = vpop.f32.mrb[20].mxu1 }
 0x308   : > { %v4601_v63 = vadd.f32 %v4571_v35, %v5786_v16  ;;  %v3066_v37 = vpop.f32.mrb[21].mxu1 }
 0x309   : > { %v3232_v20 = vadd.f32 %v3231_v3, %v3201_v59  ;;  %v4602_v19 = vadd.f32 %v3066_v37, %v5788_v30  ;;  %v4572_v46 = vpop.f32.mrb[22].mxu1 }
 0x30a   : > { %v4603_v0 = vadd.f32 %v4572_v46, %v5790_v48  ;;  %v3069_v34 = vpop.f32.mrb[23].mxu1  ;;  %v3174_v2 = vadd.f32 %v4601_v63, %v5813_v45 }
 0x30b   : > { %v3233_v51 = vadd.f32 %v3232_v20, %v3202_v5  ;;  %v3172_v18 = vadd.f32 %v4602_v19, %v5813_v45  ;;  %v4604_v7 = vadd.f32 %v3069_v34, %v5792_v49 }
 0x30c   : > { %v3175_v42 = vadd.f32 %v4603_v0, %v5813_v45  ;;  %v3206_v1 = vmax.f32 %v3174_v2, 0.0 }
 0x30d   : > { %v3204_v26 = vmax.f32 %v3172_v18, 0.0  ;;  %v3234_v41 = vadd.f32 %v3233_v51, %v3203_v17  ;;  %v3173_v16 = vadd.f32 %v4604_v7, %v5813_v45 }
 0x30e   : > { %v3207_v21 = vmax.f32 %v3175_v42, 0.0 }
 0x30f   : > { %v3235_v6 = vadd.f32 %v3234_v41, %v3204_v26  ;;  %v3205_v30 = vmax.f32 %v3173_v16, 0.0  ;;  %v4575_v8 = vpop.f32.mrb[24].mxu1 }
 0x310   : > { %v4605_v48 = vadd.f32 %v4575_v8, %v5794_v55  ;;  %v3082_v11 = vpop.f32.mrb[25].mxu1 }
 0x311   : > { %v3236_v23 = vadd.f32 %v3235_v6, %v3205_v30  ;;  %v4606_v12 = vadd.f32 %v3082_v11, %v5796_v61  ;;  %v4576_v60 = vpop.f32.mrb[26].mxu1 }
 0x312   : > { %v4607_v49 = vadd.f32 %v4576_v60, %v5798_v25  ;;  %v3085_v13 = vpop.f32.mrb[27].mxu1  ;;  %v3178_v53 = vadd.f32 %v4605_v48, %v5813_v45 }
 0x313   : > { %v3237_v31 = vadd.f32 %v3236_v23, %v3206_v1  ;;  %v3176_v14 = vadd.f32 %v4606_v12, %v5813_v45  ;;  %v4608_v36 = vadd.f32 %v3085_v13, %v5800_v54 }
 0x314   : > { %v3179_v4 = vadd.f32 %v4607_v49, %v5813_v45  ;;  %v3210_v57 = vmax.f32 %v3178_v53, 0.0 }
 0x315   : > { %v3208_v15 = vmax.f32 %v3176_v14, 0.0  ;;  %v3238_v56 = vadd.f32 %v3237_v31, %v3207_v21  ;;  %v3177_v55 = vadd.f32 %v4608_v36, %v5813_v45 }
 0x316   : > { %v3211_v32 = vmax.f32 %v3179_v4, 0.0 }
 0x317   : > { %v3239_v29 = vadd.f32 %v3238_v56, %v3208_v15  ;;  %v3209_v61 = vmax.f32 %v3177_v55, 0.0  ;;  %v4579_v9 = vpop.f32.mrb[28].mxu1 }
 0x318   : > { %v4609_v25 = vadd.f32 %v4579_v9, %v5802_v62  ;;  %v3098_v52 = vpop.f32.mrb[29].mxu1 }
 0x319   : > { %v3240_v10 = vadd.f32 %v3239_v29, %v3209_v61  ;;  %v4610_v38 = vadd.f32 %v3098_v52, %v5804_v22  ;;  %v4580_v27 = vpop.f32.mrb[30].mxu1 }
 0x31a   : > { %v4611_v54 = vadd.f32 %v4580_v27, %v5806_v24  ;;  %v3101_v28 = vpop.f32.mrb[31].mxu1  ;;  %v3182_v33 = vadd.f32 %v4609_v25, %v5813_v45 }
 0x31b   : > { %v3241_v43 = vadd.f32 %v3240_v10, %v3210_v57  ;;  %v3180_v39 = vadd.f32 %v4610_v38, %v5813_v45  ;;  %v4612_v47 = vadd.f32 %v3101_v28, %v5808_v44 }
 0x31c   : > { %v3183_v22 = vadd.f32 %v4611_v54, %v5813_v45  ;;  %v3214_v59 = vmax.f32 %v3182_v33, 0.0 }
 0x31d   : > { %v3212_v50 = vmax.f32 %v3180_v39, 0.0  ;;  %v3242_v58 = vadd.f32 %v3241_v43, %v3211_v32  ;;  %v3181_v62 = vadd.f32 %v4612_v47, %v5813_v45 }
 0x31e   : > { %v3215_v35 = vmax.f32 %v3183_v22, 0.0 }
 0x31f   : > { %v3243_v3 = vadd.f32 %v3242_v58, %v3212_v50  ;;  %v3213_v40 = vmax.f32 %v3181_v62, 0.0 }
 0x321   : > { %v3244_v24 = vadd.f32 %v3243_v3, %v3213_v40 }
 0x323   : > { %v3245_v63 = vadd.f32 %v3244_v24, %v3214_v59 }
 0x325   : > { %v3246_v37 = vadd.f32 %v3245_v63, %v3215_v35 }
 0x327   : > { %v3247_v5 = vrot.slane %v3246_v37, 4 }
 0x329   : > { %v3248_v20 = vadd.f32 %v3247_v5, %v3246_v37 }
 0x32b   : > { %v3249_v19 = vrot.slane %v3248_v20, 2 }
 0x32d   : > { %v3250_v44 = vadd.f32 %v3249_v19, %v3248_v20 }
 0x32f   : > { %v3251_v46 = vrot.slane %v3250_v44, 1 }
 0x331   : > { %v3252_v0 = vadd.f32 %v3251_v46, %v3250_v44 }
 0x333   : > { %v3254_v34 = vmul.f32 0.00390625, %v3252_v0 }
 0x335   : > { %3255 = vst [vmem:[%s220_s30] sm:$0x1] %v3254_v34 }
 0x336 PF: > { %s15_s18 = sadd.s32 1, %s4949_s18  }
 0x337   : > { %p12_p4 = scmp.ge.s32.totalorder %s15_s18, 4  }
 0x339   :  { %14 = sbr.rel (!%p12_p4) target bundleno = 1 (0x1), region = 78 }

</bundles_post_ra>
